<compile_context>
chip_gen: v5e
topology: v5e:2x2
jax: 0.10.0
libtpu: 0.0.40
codegen_flags: <defaults>
</compile_context>

<pallas_src>
import functools

import jax
import jax.numpy as jnp
from jax.experimental import pallas as pl
from jax.experimental.pallas import tpu as pltpu


# ---------------------------------------------------------------------------
# Kernel
# ---------------------------------------------------------------------------
def _lfnn_kernel(
    x_ref,
    wp1_ref, bp1_ref,          # fused branch layer 1: [D, 1500], [1, 1500]
    wp2_ref, bp2_ref,          # fused branch layer 2: [1500, 300], [1, 300]
    wm1_ref, bm1_ref,          # merge: [300, 100]
    wm2_ref, bm2_ref,          # merge: [100, 50]
    wm3_ref, bm3_ref,          # merge: [50, 10]
    wm4_ref, bm4_ref,          # merge: [10, num_classes]
    out_ref,
):
    def dot(a, b):
        return jnp.dot(a, b, preferred_element_type=jnp.float32)

    x = x_ref[...]
    # Fused first layers of FC_1/FC_2/FC_3 (block-diagonal weight also encodes
    # the original off-by-one input slicing).  (Dropout = identity in eval.)
    h = jnp.maximum(dot(x, wp1_ref[...]) + bp1_ref[...], 0.0)
    # Fused second layers -> equivalent to torch.cat((h1, h2, h3), 1).
    h = jnp.maximum(dot(h, wp2_ref[...]) + bp2_ref[...], 0.0)
    # FC_merge
    m = jnp.maximum(dot(h, wm1_ref[...]) + bm1_ref[...], 0.0)
    m = jnp.maximum(dot(m, wm2_ref[...]) + bm2_ref[...], 0.0)
    m = jnp.maximum(dot(m, wm3_ref[...]) + bm3_ref[...], 0.0)
    logits = dot(m, wm4_ref[...]) + bm4_ref[...]
    # num_classes == 2 path: elementwise sigmoid (EUP).
    out_ref[...] = jax.nn.sigmoid(logits)


# ---------------------------------------------------------------------------
# Parameters (PyTorch-Linear-style init) and packing into fused form
# ---------------------------------------------------------------------------
def init_params(key, in_dim, num_classes, dtype=jnp.float32):
    """Deterministic PyTorch-Linear-style init: U(-1/sqrt(fan_in), 1/sqrt(fan_in))."""
    shapes = {
        # branch 1
        "w1a": (in_dim[0], 500), "b1a": (1, 500),
        "w1b": (500, 100),       "b1b": (1, 100),
        # branch 2
        "w2a": (in_dim[1], 500), "b2a": (1, 500),
        "w2b": (500, 100),       "b2b": (1, 100),
        # branch 3
        "w3a": (in_dim[2], 500), "b3a": (1, 500),
        "w3b": (500, 100),       "b3b": (1, 100),
        # merge
        "wm1": (300, 100), "bm1": (1, 100),
        "wm2": (100, 50),  "bm2": (1, 50),
        "wm3": (50, 10),   "bm3": (1, 10),
        "wm4": (10, num_classes), "bm4": (1, num_classes),
    }
    fan_in = {
        "w1a": in_dim[0], "b1a": in_dim[0], "w1b": 500, "b1b": 500,
        "w2a": in_dim[1], "b2a": in_dim[1], "w2b": 500, "b2b": 500,
        "w3a": in_dim[2], "b3a": in_dim[2], "w3b": 500, "b3b": 500,
        "wm1": 300, "bm1": 300, "wm2": 100, "bm2": 100,
        "wm3": 50, "bm3": 50, "wm4": 10, "bm4": 10,
    }
    params = {}
    keys = jax.random.split(key, len(shapes))
    for k, (name, shp) in zip(keys, shapes.items()):
        bound = 1.0 / (fan_in[name] ** 0.5)
        params[name] = jax.random.uniform(k, shp, dtype, minval=-bound, maxval=bound)
    return params


def pack_params(params, in_dim):
    """Host-side, one-time packing of the three branches into block-diagonal weights.

    The packed first-layer weight reproduces the original (off-by-one) slicing
    exactly: input column d0 is never used (zero rows), and input column d0+d1
    is consumed by both branch 2 and branch 3 (its row carries both weights).
    """
    d0, d1, d2 = in_dim
    D = d0 + d1 + d2
    p = params
    dtype = p["w1a"].dtype

    wp1 = jnp.zeros((D, 1500), dtype)
    wp1 = wp1.at[:d0, 0:500].set(p["w1a"])                      # x[:, :d0]
    wp1 = wp1.at[d0 + 1:d0 + d1 + 1, 500:1000].set(p["w2a"])    # x[:, d0+1 : d0+d1+1]
    wp1 = wp1.at[d0 + d1:D, 1000:1500].set(p["w3a"])            # x[:, d0+d1 : ] (clamped)
    bp1 = jnp.concatenate([p["b1a"], p["b2a"], p["b3a"]], axis=1)

    wp2 = jnp.zeros((1500, 300), dtype)
    wp2 = wp2.at[0:500, 0:100].set(p["w1b"])
    wp2 = wp2.at[500:1000, 100:200].set(p["w2b"])
    wp2 = wp2.at[1000:1500, 200:300].set(p["w3b"])
    bp2 = jnp.concatenate([p["b1b"], p["b2b"], p["b3b"]], axis=1)

    packed = {"wp1": wp1, "bp1": bp1, "wp2": wp2, "bp2": bp2}
    for k in ("wm1", "bm1", "wm2", "bm2", "wm3", "bm3", "wm4", "bm4"):
        packed[k] = p[k]
    return packed


# ---------------------------------------------------------------------------
# Forward wrapper
# ---------------------------------------------------------------------------
@functools.partial(jax.jit, static_argnames=("num_classes", "tb"))
def lfnn_forward(x, packed, num_classes, tb=512):
    B, D = x.shape
    tb = min(tb, B)                       # single tile for small batches
    grid = (pl.cdiv(B, tb),)

    order = ["wp1", "bp1", "wp2", "bp2", "wm1", "bm1",
             "wm2", "bm2", "wm3", "bm3", "wm4", "bm4"]
    weights = [packed[k] for k in order]

    x_spec = pl.BlockSpec((tb, D), lambda i: (i, 0))
    out_spec = pl.BlockSpec((tb, num_classes), lambda i: (i, 0))
    # Weights/biases: full block, constant index_map -> fetched once, resident.
    w_specs = [pl.BlockSpec(w.shape, lambda i: (0, 0)) for w in weights]

    weight_bytes = sum(int(w.size) * w.dtype.itemsize for w in weights)
    flops = 2 * B * (D * 1500 + 1500 * 300 + 300 * 100
                     + 100 * 50 + 50 * 10 + 10 * num_classes)
    cost = pl.CostEstimate(
        flops=flops,
        transcendentals=B * num_classes,
        bytes_accessed=4 * B * (D + num_classes) + weight_bytes,
    )

    return pl.pallas_call(
        _lfnn_kernel,
        out_shape=jax.ShapeDtypeStruct((B, num_classes), jnp.float32),
        grid=grid,
        in_specs=[x_spec] + w_specs,
        out_specs=out_spec,
        compiler_params=pltpu.CompilerParams(
            dimension_semantics=("parallel",),      # shards batch across TCs on v7x
            vmem_limit_bytes=32 * 1024 * 1024,      # > v5e 16 MiB default, < v7x physical
        ),
        cost_estimate=cost,
    )(x, *weights)


# ---------------------------------------------------------------------------
# Pure-JAX reference (unfused, exact original slicing) for correctness checks
# ---------------------------------------------------------------------------
def lfnn_reference(x, params, in_dim, num_classes):
    d0, d1, d2 = in_dim
    x1 = x[:, :d0]
    x2 = x[:, d0 + 1: d0 + d1 + 1]
    x3 = x[:, d0 + d1: d0 + d1 + d2 + 1]   # end index clamps (slice semantics)
    p = params

    def branch(xx, wa, ba, wb, bb):
        h = jax.nn.relu(xx @ wa + ba)
        return jax.nn.relu(h @ wb + bb)

    h1 = branch(x1, p["w1a"], p["b1a"], p["w1b"], p["b1b"])
    h2 = branch(x2, p["w2a"], p["b2a"], p["w2b"], p["b2b"])
    h3 = branch(x3, p["w3a"], p["b3a"], p["w3b"], p["b3b"])
    h = jnp.concatenate([h1, h2, h3], axis=1)
    m = jax.nn.relu(h @ p["wm1"] + p["bm1"])
    m = jax.nn.relu(m @ p["wm2"] + p["bm2"])
    m = jax.nn.relu(m @ p["wm3"] + p["bm3"])
    logits = m @ p["wm4"] + p["bm4"]
    return jax.nn.sigmoid(logits)


if __name__ == "__main__":
    in_dim = (12, 10, 14)          # three modality widths
    num_classes = 2                # sigmoid path

    key = jax.random.PRNGKey(0)
    k_x, k_p, k_x2 = jax.random.split(key, 3)
    params = init_params(k_p, in_dim, num_classes)
    packed = pack_params(params, in_dim)

    # Small batch: single grid step (block == full array).
    B = 4
    x = jax.random.normal(k_x, (B, sum(in_dim)), dtype=jnp.float32)
    out = jax.block_until_ready(lfnn_forward(x, packed, num_classes))
    ref = lfnn_reference(x, params, in_dim, num_classes)
    assert out.shape == (B, num_classes), out.shape
    assert jnp.allclose(out, ref, atol=2e-5, rtol=2e-5), (out, ref)

    # Larger batch: exercises the batch grid, resident weights and a partial
    # last tile (300 rows with a 128-row tile -> grid=(3,)).
    B2 = 300
    x2 = jax.random.normal(k_x2, (B2, sum(in_dim)), dtype=jnp.float32)
    out2 = jax.block_until_ready(lfnn_forward(x2, packed, num_classes, tb=128))
    ref2 = lfnn_reference(x2, params, in_dim, num_classes)
    assert out2.shape == (B2, num_classes), out2.shape
    assert jnp.allclose(out2, ref2, atol=2e-5, rtol=2e-5)

    print("KERNEL_OK")
</pallas_src>

<mosaic_0001>
module attributes {stable_mosaic.version = 11 : i64} {
  func.func @_lfnn_kernel(%arg0: i32, %arg1: memref<4x36xf32, #tpu.memory_space<vmem>>, %arg2: memref<36x1500xf32, #tpu.memory_space<vmem>>, %arg3: memref<1x1500xf32, #tpu.memory_space<vmem>>, %arg4: memref<1500x300xf32, #tpu.memory_space<vmem>>, %arg5: memref<1x300xf32, #tpu.memory_space<vmem>>, %arg6: memref<300x100xf32, #tpu.memory_space<vmem>>, %arg7: memref<1x100xf32, #tpu.memory_space<vmem>>, %arg8: memref<100x50xf32, #tpu.memory_space<vmem>>, %arg9: memref<1x50xf32, #tpu.memory_space<vmem>>, %arg10: memref<50x10xf32, #tpu.memory_space<vmem>>, %arg11: memref<1x10xf32, #tpu.memory_space<vmem>>, %arg12: memref<10x2xf32, #tpu.memory_space<vmem>>, %arg13: memref<1x2xf32, #tpu.memory_space<vmem>>, %arg14: memref<4x2xf32, #tpu.memory_space<vmem>>) attributes {dimension_semantics = [#tpu.dimension_semantics<parallel>], iteration_bounds = array<i64: 1>, scalar_prefetch = 0 : i64, scratch_operands = 0 : i64, tpu.core_type = #tpu.core_type<tc>, window_params = [{transform_indices = @transform_0, window_bounds = array<i64: 4, 36>}, {pipeline_mode = #tpu.pipeline_mode<synchronous>, transform_indices = @transform_1, window_bounds = array<i64: 36, 1500>}, {pipeline_mode = #tpu.pipeline_mode<synchronous>, transform_indices = @transform_2, window_bounds = array<i64: 1, 1500>}, {pipeline_mode = #tpu.pipeline_mode<synchronous>, transform_indices = @transform_3, window_bounds = array<i64: 1500, 300>}, {pipeline_mode = #tpu.pipeline_mode<synchronous>, transform_indices = @transform_4, window_bounds = array<i64: 1, 300>}, {pipeline_mode = #tpu.pipeline_mode<synchronous>, transform_indices = @transform_5, window_bounds = array<i64: 300, 100>}, {pipeline_mode = #tpu.pipeline_mode<synchronous>, transform_indices = @transform_6, window_bounds = array<i64: 1, 100>}, {pipeline_mode = #tpu.pipeline_mode<synchronous>, transform_indices = @transform_7, window_bounds = array<i64: 100, 50>}, {pipeline_mode = #tpu.pipeline_mode<synchronous>, transform_indices = @transform_8, window_bounds = array<i64: 1, 50>}, {pipeline_mode = #tpu.pipeline_mode<synchronous>, transform_indices = @transform_9, window_bounds = array<i64: 50, 10>}, {pipeline_mode = #tpu.pipeline_mode<synchronous>, transform_indices = @transform_10, window_bounds = array<i64: 1, 10>}, {pipeline_mode = #tpu.pipeline_mode<synchronous>, transform_indices = @transform_11, window_bounds = array<i64: 10, 2>}, {pipeline_mode = #tpu.pipeline_mode<synchronous>, transform_indices = @transform_12, window_bounds = array<i64: 1, 2>}, {transform_indices = @transform_13, window_bounds = array<i64: 4, 2>}]} {
    %c0 = arith.constant 0 : index
    %c0_0 = arith.constant 0 : index
    %0 = vector.load %arg1[%c0, %c0_0] : memref<4x36xf32, #tpu.memory_space<vmem>>, vector<4x36xf32>
    %c0_1 = arith.constant 0 : index
    %c0_2 = arith.constant 0 : index
    %1 = vector.load %arg2[%c0_1, %c0_2] : memref<36x1500xf32, #tpu.memory_space<vmem>>, vector<36x1500xf32>
    %cst = arith.constant dense<0.000000e+00> : vector<4x1500xf32>
    %2 = tpu.matmul %0, %1, %cst {dimension_numbers = #tpu.dot_dimension_numbers<[1], [0], [0], [1], [0, 0, 1, 1], [], []>} : vector<4x36xf32>, vector<36x1500xf32>, vector<4x1500xf32> -> vector<4x1500xf32>
    %c0_3 = arith.constant 0 : index
    %c0_4 = arith.constant 0 : index
    %3 = vector.load %arg3[%c0_3, %c0_4] : memref<1x1500xf32, #tpu.memory_space<vmem>>, vector<1x1500xf32>
    %4 = vector.broadcast %3 : vector<1x1500xf32> to vector<4x1500xf32>
    %5 = arith.addf %2, %4 : vector<4x1500xf32>
    %cst_5 = arith.constant 0.000000e+00 : f32
    %6 = vector.broadcast %cst_5 : f32 to vector<4x1500xf32>
    %7 = arith.maximumf %5, %6 : vector<4x1500xf32>
    %c0_6 = arith.constant 0 : index
    %c0_7 = arith.constant 0 : index
    %8 = vector.load %arg4[%c0_6, %c0_7] : memref<1500x300xf32, #tpu.memory_space<vmem>>, vector<1500x300xf32>
    %cst_8 = arith.constant dense<0.000000e+00> : vector<4x300xf32>
    %9 = tpu.matmul %7, %8, %cst_8 {dimension_numbers = #tpu.dot_dimension_numbers<[1], [0], [0], [1], [0, 0, 1, 1], [], []>} : vector<4x1500xf32>, vector<1500x300xf32>, vector<4x300xf32> -> vector<4x300xf32>
    %c0_9 = arith.constant 0 : index
    %c0_10 = arith.constant 0 : index
    %10 = vector.load %arg5[%c0_9, %c0_10] : memref<1x300xf32, #tpu.memory_space<vmem>>, vector<1x300xf32>
    %11 = vector.broadcast %10 : vector<1x300xf32> to vector<4x300xf32>
    %12 = arith.addf %9, %11 : vector<4x300xf32>
    %cst_11 = arith.constant 0.000000e+00 : f32
    %13 = vector.broadcast %cst_11 : f32 to vector<4x300xf32>
    %14 = arith.maximumf %12, %13 : vector<4x300xf32>
    %c0_12 = arith.constant 0 : index
    %c0_13 = arith.constant 0 : index
    %15 = vector.load %arg6[%c0_12, %c0_13] : memref<300x100xf32, #tpu.memory_space<vmem>>, vector<300x100xf32>
    %cst_14 = arith.constant dense<0.000000e+00> : vector<4x100xf32>
    %16 = tpu.matmul %14, %15, %cst_14 {dimension_numbers = #tpu.dot_dimension_numbers<[1], [0], [0], [1], [0, 0, 1, 1], [], []>} : vector<4x300xf32>, vector<300x100xf32>, vector<4x100xf32> -> vector<4x100xf32>
    %c0_15 = arith.constant 0 : index
    %c0_16 = arith.constant 0 : index
    %17 = vector.load %arg7[%c0_15, %c0_16] : memref<1x100xf32, #tpu.memory_space<vmem>>, vector<1x100xf32>
    %18 = vector.broadcast %17 : vector<1x100xf32> to vector<4x100xf32>
    %19 = arith.addf %16, %18 : vector<4x100xf32>
    %cst_17 = arith.constant 0.000000e+00 : f32
    %20 = vector.broadcast %cst_17 : f32 to vector<4x100xf32>
    %21 = arith.maximumf %19, %20 : vector<4x100xf32>
    %c0_18 = arith.constant 0 : index
    %c0_19 = arith.constant 0 : index
    %22 = vector.load %arg8[%c0_18, %c0_19] : memref<100x50xf32, #tpu.memory_space<vmem>>, vector<100x50xf32>
    %cst_20 = arith.constant dense<0.000000e+00> : vector<4x50xf32>
    %23 = tpu.matmul %21, %22, %cst_20 {dimension_numbers = #tpu.dot_dimension_numbers<[1], [0], [0], [1], [0, 0, 1, 1], [], []>} : vector<4x100xf32>, vector<100x50xf32>, vector<4x50xf32> -> vector<4x50xf32>
    %c0_21 = arith.constant 0 : index
    %c0_22 = arith.constant 0 : index
    %24 = vector.load %arg9[%c0_21, %c0_22] : memref<1x50xf32, #tpu.memory_space<vmem>>, vector<1x50xf32>
    %25 = vector.broadcast %24 : vector<1x50xf32> to vector<4x50xf32>
    %26 = arith.addf %23, %25 : vector<4x50xf32>
    %cst_23 = arith.constant 0.000000e+00 : f32
    %27 = vector.broadcast %cst_23 : f32 to vector<4x50xf32>
    %28 = arith.maximumf %26, %27 : vector<4x50xf32>
    %c0_24 = arith.constant 0 : index
    %c0_25 = arith.constant 0 : index
    %29 = vector.load %arg10[%c0_24, %c0_25] : memref<50x10xf32, #tpu.memory_space<vmem>>, vector<50x10xf32>
    %cst_26 = arith.constant dense<0.000000e+00> : vector<4x10xf32>
    %30 = tpu.matmul %28, %29, %cst_26 {dimension_numbers = #tpu.dot_dimension_numbers<[1], [0], [0], [1], [0, 0, 1, 1], [], []>} : vector<4x50xf32>, vector<50x10xf32>, vector<4x10xf32> -> vector<4x10xf32>
    %c0_27 = arith.constant 0 : index
    %c0_28 = arith.constant 0 : index
    %31 = vector.load %arg11[%c0_27, %c0_28] : memref<1x10xf32, #tpu.memory_space<vmem>>, vector<1x10xf32>
    %32 = vector.broadcast %31 : vector<1x10xf32> to vector<4x10xf32>
    %33 = arith.addf %30, %32 : vector<4x10xf32>
    %cst_29 = arith.constant 0.000000e+00 : f32
    %34 = vector.broadcast %cst_29 : f32 to vector<4x10xf32>
    %35 = arith.maximumf %33, %34 : vector<4x10xf32>
    %c0_30 = arith.constant 0 : index
    %c0_31 = arith.constant 0 : index
    %36 = vector.load %arg12[%c0_30, %c0_31] : memref<10x2xf32, #tpu.memory_space<vmem>>, vector<10x2xf32>
    %cst_32 = arith.constant dense<0.000000e+00> : vector<4x2xf32>
    %37 = tpu.matmul %35, %36, %cst_32 {dimension_numbers = #tpu.dot_dimension_numbers<[1], [0], [0], [1], [0, 0, 1, 1], [], []>} : vector<4x10xf32>, vector<10x2xf32>, vector<4x2xf32> -> vector<4x2xf32>
    %c0_33 = arith.constant 0 : index
    %c0_34 = arith.constant 0 : index
    %38 = vector.load %arg13[%c0_33, %c0_34] : memref<1x2xf32, #tpu.memory_space<vmem>>, vector<1x2xf32>
    %39 = vector.broadcast %38 : vector<1x2xf32> to vector<4x2xf32>
    %40 = arith.addf %37, %39 : vector<4x2xf32>
    %41 = arith.negf %40 : vector<4x2xf32>
    %42 = math.exp %41 : vector<4x2xf32>
    %cst_35 = arith.constant 1.000000e+00 : f32
    %43 = vector.broadcast %cst_35 : f32 to vector<4x2xf32>
    %44 = arith.addf %43, %42 : vector<4x2xf32>
    %45 = arith.divf %43, %44 : vector<4x2xf32>
    %c0_36 = arith.constant 0 : index
    %c0_37 = arith.constant 0 : index
    %46 = vector.load %arg14[%c0_36, %c0_37] : memref<4x2xf32, #tpu.memory_space<vmem>>, vector<4x2xf32>
    tpu.vector_store %arg14[%c0_36, %c0_37], %45 {strides = array<i32>} : memref<4x2xf32, #tpu.memory_space<vmem>>, vector<4x2xf32>,
    return
  }
  func.func @transform_0(%arg0: i32) -> (i32, i32) {
    %c0_i32 = arith.constant 0 : i32
    %c0_i32_0 = arith.constant 0 : i32
    return %arg0, %c0_i32 : i32, i32
  }
  func.func @transform_1(%arg0: i32) -> (i32, i32) {
    %c0_i32 = arith.constant 0 : i32
    %c0_i32_0 = arith.constant 0 : i32
    %c0_i32_1 = arith.constant 0 : i32
    return %c0_i32, %c0_i32_0 : i32, i32
  }
  func.func @transform_2(%arg0: i32) -> (i32, i32) {
    %c0_i32 = arith.constant 0 : i32
    %c0_i32_0 = arith.constant 0 : i32
    %c0_i32_1 = arith.constant 0 : i32
    return %c0_i32, %c0_i32_0 : i32, i32
  }
  func.func @transform_3(%arg0: i32) -> (i32, i32) {
    %c0_i32 = arith.constant 0 : i32
    %c0_i32_0 = arith.constant 0 : i32
    %c0_i32_1 = arith.constant 0 : i32
    return %c0_i32, %c0_i32_0 : i32, i32
  }
  func.func @transform_4(%arg0: i32) -> (i32, i32) {
    %c0_i32 = arith.constant 0 : i32
    %c0_i32_0 = arith.constant 0 : i32
    %c0_i32_1 = arith.constant 0 : i32
    return %c0_i32, %c0_i32_0 : i32, i32
  }
  func.func @transform_5(%arg0: i32) -> (i32, i32) {
    %c0_i32 = arith.constant 0 : i32
    %c0_i32_0 = arith.constant 0 : i32
    %c0_i32_1 = arith.constant 0 : i32
    return %c0_i32, %c0_i32_0 : i32, i32
  }
  func.func @transform_6(%arg0: i32) -> (i32, i32) {
    %c0_i32 = arith.constant 0 : i32
    %c0_i32_0 = arith.constant 0 : i32
    %c0_i32_1 = arith.constant 0 : i32
    return %c0_i32, %c0_i32_0 : i32, i32
  }
  func.func @transform_7(%arg0: i32) -> (i32, i32) {
    %c0_i32 = arith.constant 0 : i32
    %c0_i32_0 = arith.constant 0 : i32
    %c0_i32_1 = arith.constant 0 : i32
    return %c0_i32, %c0_i32_0 : i32, i32
  }
  func.func @transform_8(%arg0: i32) -> (i32, i32) {
    %c0_i32 = arith.constant 0 : i32
    %c0_i32_0 = arith.constant 0 : i32
    %c0_i32_1 = arith.constant 0 : i32
    return %c0_i32, %c0_i32_0 : i32, i32
  }
  func.func @transform_9(%arg0: i32) -> (i32, i32) {
    %c0_i32 = arith.constant 0 : i32
    %c0_i32_0 = arith.constant 0 : i32
    %c0_i32_1 = arith.constant 0 : i32
    return %c0_i32, %c0_i32_0 : i32, i32
  }
  func.func @transform_10(%arg0: i32) -> (i32, i32) {
    %c0_i32 = arith.constant 0 : i32
    %c0_i32_0 = arith.constant 0 : i32
    %c0_i32_1 = arith.constant 0 : i32
    return %c0_i32, %c0_i32_0 : i32, i32
  }
  func.func @transform_11(%arg0: i32) -> (i32, i32) {
    %c0_i32 = arith.constant 0 : i32
    %c0_i32_0 = arith.constant 0 : i32
    %c0_i32_1 = arith.constant 0 : i32
    return %c0_i32, %c0_i32_0 : i32, i32
  }
  func.func @transform_12(%arg0: i32) -> (i32, i32) {
    %c0_i32 = arith.constant 0 : i32
    %c0_i32_0 = arith.constant 0 : i32
    %c0_i32_1 = arith.constant 0 : i32
    return %c0_i32, %c0_i32_0 : i32, i32
  }
  func.func @transform_13(%arg0: i32) -> (i32, i32) {
    %c0_i32 = arith.constant 0 : i32
    %c0_i32_0 = arith.constant 0 : i32
    return %arg0, %c0_i32 : i32, i32
  }
}

</mosaic_0001>

<bundles_post_ra>
// kernel: lfnn_forward.1
= control target key start
LH: loop header
LB: loop body
LE: loop exit
PB: predicated region body
PF: predicated region fallthrough
CT: control target
= control target key end

     0   :  { %vm137_vm0 = vcmask 1043456   ;;  %vm133_vm1 = vcmask 293888   ;;  %vm998_vm2 = vcmask 752640   ;;  %vm1776_vm3 = vcmask 359424   ;;  %s4321_s1 = inlined_call_operand.vmem [shape: f32[36,1500], index: 1, kind: input, shape index: {}]   ;;  %s4322_s0 = inlined_call_operand.vmem [shape: f32[4,36], index: 0, kind: input, shape index: {}]   ;;  %s4323_s3 = inlined_call_operand.vmem [shape: f32[1500,300], index: 3, kind: input, shape index: {}]   ;;  %s4324_s2 = inlined_call_operand.vmem [shape: f32[1,1500], index: 2, kind: input, shape index: {}]   ;;  %s4325_s4 = inlined_call_operand.vmem [shape: f32[1,300], index: 4, kind: input, shape index: {}]   ;;  %s4326_s5 = inlined_call_operand.vmem [shape: f32[300,100], index: 5, kind: input, shape index: {}]   ;;  %s4327_s6 = inlined_call_operand.vmem [shape: f32[1,100], index: 6, kind: input, shape index: {}]   ;;  %s4328_s7 = inlined_call_operand.vmem [shape: f32[100,50], index: 7, kind: input, shape index: {}]   ;;  %s4329_s8 = inlined_call_operand.vmem [shape: f32[1,50], index: 8, kind: input, shape index: {}]   ;;  %s4330_s9 = inlined_call_operand.vmem [shape: f32[50,10], index: 9, kind: input, shape index: {}]   ;;  %s4331_s10 = inlined_call_operand.vmem [shape: f32[1,10], index: 10, kind: input, shape index: {}]   ;;  %s4332_s11 = inlined_call_operand.vmem [shape: f32[10,2], index: 11, kind: input, shape index: {}]   ;;  %s4333_s12 = inlined_call_operand.vmem [shape: f32[1,2], index: 12, kind: input, shape index: {}]   ;;  %s4334_s13 = inlined_call_operand.vmem [shape: f32[4,2], index: 13, kind: output, shape index: {}]  }
   0x1   :  { %v93_v0 = vld [vmem:[%s4321_s1 + $0x180] sm:$0xf]  ;;  %v94_v1 = vld [vmem:[%s4321_s1 + $0x188] sm:$0xf]  ;;  %v95_v2 = vld [vmem:[%s4321_s1 + $0x190] sm:$0xf] }
   0x2   :  { %1987 = vmatpush.msk.msra.mxu0 %vm137_vm0, %v93_v0  ;;  %1989 = vmatpush.msk.msra.mxu1 %vm137_vm0, %v94_v1  ;;  %v96_v3 = vld [vmem:[%s4321_s1 + $0x198] sm:$0xf]  ;;  %v81_v4 = vld [vmem:[%s4321_s1 + $0x120] sm:$0xff]  ;;  %v82_v5 = vld [vmem:[%s4321_s1 + $0x128] sm:$0xff]  ;;  %vm1904_vm4 = vcmask 1041408   ;;  %vm1861_vm5 = vcmask 818176  }
   0x3   :  { %1991 = vmatpush.msk.msra.mxu2 %vm137_vm0, %v95_v2  ;;  %1993 = vmatpush.msk.msra.mxu3 %vm137_vm0, %v96_v3  ;;  %v83_v6 = vld [vmem:[%s4321_s1 + $0x130] sm:$0xff]  ;;  %v84_v7 = vld [vmem:[%s4321_s1 + $0x138] sm:$0xff]  ;;  %v69_v8 = vld [vmem:[%s4321_s1 + $0xc0] sm:$0xff]  ;;  %vm1900_vm6 = vcmask 408576   ;;  %vm1935_vm7 = vcmask 80896   ;;  %vm1981_vm11 = vcmask 11264  }
   0x4   :  { %186 = vmatpush.msra.mxu0 %v81_v4  ;;  %206 = vmatpush.msra.mxu1 %v82_v5  ;;  %v70_v9 = vld [vmem:[%s4321_s1 + $0xc8] sm:$0xff]  ;;  %v71_v10 = vld [vmem:[%s4321_s1 + $0xd0] sm:$0xff]  ;;  %v72_v11 = vld [vmem:[%s4321_s1 + $0xd8] sm:$0xff] }
   0x5   :  { %226 = vmatpush.msra.mxu2 %v83_v6  ;;  %246 = vmatpush.msra.mxu3 %v84_v7  ;;  %v57_v12 = vld [vmem:[%s4321_s1 + $0x60] sm:$0xff]  ;;  %v58_v13 = vld [vmem:[%s4321_s1 + $0x68] sm:$0xff]  ;;  %v59_v14 = vld [vmem:[%s4321_s1 + $0x70] sm:$0xff] }
   0x6   :  { %187 = vmatpush.msra.mxu0 %v69_v8  ;;  %207 = vmatpush.msra.mxu1 %v70_v9  ;;  %v60_v15 = vld [vmem:[%s4321_s1 + $0x78] sm:$0xff]  ;;  %v45_v16 = vld [vmem:[%s4321_s1] sm:$0xff]  ;;  %v46_v17 = vld [vmem:[%s4321_s1 + $0x8] sm:$0xff] }
   0x7   :  { %227 = vmatpush.msra.mxu2 %v71_v10  ;;  %247 = vmatpush.msra.mxu3 %v72_v11  ;;  %v47_v18 = vld [vmem:[%s4321_s1 + $0x10] sm:$0xff]  ;;  %v48_v19 = vld [vmem:[%s4321_s1 + $0x18] sm:$0xff]  ;;  %v2171_v20 = vld [vmem:[%s4322_s0] sm:$0xf] }
   0x8   :  { %188 = vmatpush.msra.mxu0 %v57_v12  ;;  %208 = vmatpush.msra.mxu1 %v58_v13  ;;  %v99_v21 = vld [vmem:[%s4321_s1 + $0x1b0] sm:$0xf]  ;;  %v100_v22 = vld [vmem:[%s4321_s1 + $0x1b8] sm:$0xf]  ;;  %v97_v23 = vld [vmem:[%s4321_s1 + $0x1a0] sm:$0xf] }
   0x9   :  { %228 = vmatpush.msra.mxu2 %v59_v14  ;;  %248 = vmatpush.msra.mxu3 %v60_v15  ;;  %v98_v24 = vld [vmem:[%s4321_s1 + $0x1a8] sm:$0xf]  ;;  %v87_v25 = vld [vmem:[%s4321_s1 + $0x150] sm:$0xff]  ;;  %v88_v26 = vld [vmem:[%s4321_s1 + $0x158] sm:$0xff] }
   0xa   :  { %189 = vmatpush.msra.mxu0 %v45_v16  ;;  %209 = vmatpush.msra.mxu1 %v46_v17  ;;  %v85_v27 = vld [vmem:[%s4321_s1 + $0x140] sm:$0xff]  ;;  %v86_v28 = vld [vmem:[%s4321_s1 + $0x148] sm:$0xff]  ;;  %v75_v29 = vld [vmem:[%s4321_s1 + $0xf0] sm:$0xff] }
   0xb   :  { %229 = vmatpush.msra.mxu2 %v47_v18  ;;  %249 = vmatpush.msra.mxu3 %v48_v19  ;;  %v76_v30 = vld [vmem:[%s4321_s1 + $0xf8] sm:$0xff]  ;;  %v73_v31 = vld [vmem:[%s4321_s1 + $0xe0] sm:$0xff]  ;;  %v74_v32 = vld [vmem:[%s4321_s1 + $0xe8] sm:$0xff] }
   0xc   :  { %1988 = vmatmul.msk.f32.vlgmr.msra.gmra.mxu0 %vm133_vm1, %v2171_v20  ;;  %1990 = vmatmul.msk.f32.vlgmr.msra.gmra.mxu1 %vm133_vm1, %v2171_v20  ;;  %v63_v33 = vld [vmem:[%s4321_s1 + $0x90] sm:$0xff]  ;;  %v64_v34 = vld [vmem:[%s4321_s1 + $0x98] sm:$0xff]  ;;  %v61_v35 = vld [vmem:[%s4321_s1 + $0x80] sm:$0xff] }
   0xd   :  { %1992 = vmatmul.msk.f32.vlgmr.msra.gmra.mxu2 %vm133_vm1, %v2171_v20  ;;  %1994 = vmatmul.msk.f32.vlgmr.msra.gmra.mxu3 %vm133_vm1, %v2171_v20  ;;  %v62_v36 = vld [vmem:[%s4321_s1 + $0x88] sm:$0xff]  ;;  %v51_v37 = vld [vmem:[%s4321_s1 + $0x30] sm:$0xff]  ;;  %v52_v38 = vld [vmem:[%s4321_s1 + $0x38] sm:$0xff] }
   0xe   :  { %1999 = vmatpush.msk.msrb.mxu2 %vm137_vm0, %v99_v21  ;;  %2001 = vmatpush.msk.msrb.mxu3 %vm137_vm0, %v100_v22  ;;  %v49_v39 = vld [vmem:[%s4321_s1 + $0x20] sm:$0xff]  ;;  %v50_v40 = vld [vmem:[%s4321_s1 + $0x28] sm:$0xff]  ;;  %v103_v42 = vld [vmem:[%s4321_s1 + $0x1d0] sm:$0xf] }
   0xf   :  { %1995 = vmatpush.msk.msrb.mxu0 %vm137_vm0, %v97_v23  ;;  %1997 = vmatpush.msk.msrb.mxu1 %vm137_vm0, %v98_v24  ;;  %v101_v41 = vld [vmem:[%s4321_s1 + $0x1c0] sm:$0xf]  ;;  %v102_v43 = vld [vmem:[%s4321_s1 + $0x1c8] sm:$0xf]  ;;  %v104_v44 = vld [vmem:[%s4321_s1 + $0x1d8] sm:$0xf] }
  0x10   :  { %306 = vmatpush.msrb.mxu2 %v87_v25  ;;  %326 = vmatpush.msrb.mxu3 %v88_v26  ;;  %v89_v45 = vld [vmem:[%s4321_s1 + $0x160] sm:$0xff]  ;;  %v91_v46 = vld [vmem:[%s4321_s1 + $0x170] sm:$0xff]  ;;  %v90_v47 = vld [vmem:[%s4321_s1 + $0x168] sm:$0xff] }
  0x11   :  { %266 = vmatpush.msrb.mxu0 %v85_v27  ;;  %286 = vmatpush.msrb.mxu1 %v86_v28  ;;  %v92_v48 = vld [vmem:[%s4321_s1 + $0x178] sm:$0xff]  ;;  %v77_v49 = vld [vmem:[%s4321_s1 + $0x100] sm:$0xff]  ;;  %v79_v50 = vld [vmem:[%s4321_s1 + $0x110] sm:$0xff] }
  0x12   :  { %307 = vmatpush.msrb.mxu2 %v75_v29  ;;  %327 = vmatpush.msrb.mxu3 %v76_v30  ;;  %v78_v51 = vld [vmem:[%s4321_s1 + $0x108] sm:$0xff]  ;;  %v80_v52 = vld [vmem:[%s4321_s1 + $0x118] sm:$0xff]  ;;  %v65_v53 = vld [vmem:[%s4321_s1 + $0xa0] sm:$0xff] }
  0x13   :  { %267 = vmatpush.msrb.mxu0 %v73_v31  ;;  %287 = vmatpush.msrb.mxu1 %v74_v32  ;;  %v67_v54 = vld [vmem:[%s4321_s1 + $0xb0] sm:$0xff]  ;;  %v66_v55 = vld [vmem:[%s4321_s1 + $0xa8] sm:$0xff]  ;;  %v68_v56 = vld [vmem:[%s4321_s1 + $0xb8] sm:$0xff] }
  0x14   :  { %308 = vmatpush.msrb.mxu2 %v63_v33  ;;  %328 = vmatpush.msrb.mxu3 %v64_v34  ;;  %v53_v57 = vld [vmem:[%s4321_s1 + $0x40] sm:$0xff]  ;;  %v55_v58 = vld [vmem:[%s4321_s1 + $0x50] sm:$0xff]  ;;  %v54_v59 = vld [vmem:[%s4321_s1 + $0x48] sm:$0xff] }
  0x15   :  { %268 = vmatpush.msrb.mxu0 %v61_v35  ;;  %288 = vmatpush.msrb.mxu1 %v62_v36  ;;  %v56_v60 = vld [vmem:[%s4321_s1 + $0x58] sm:$0xff]  ;;  %v471_v61 = vld [vmem:[%s4323_s3 + $0x168] sm:$0xff]  ;;  %v468_v1 = vld [vmem:[%s4323_s3 + $0x150] sm:$0xff] }
  0x16   :  { %309 = vmatpush.msrb.mxu2 %v51_v37  ;;  %329 = vmatpush.msrb.mxu3 %v52_v38  ;;  %v519_v62 = vld [vmem:[%s4323_s3 + $0x2e8] sm:$0xff]  ;;  %v516_v2 = vld [vmem:[%s4323_s3 + $0x2d0] sm:$0xff]  ;;  %v465_v5 = vld [vmem:[%s4323_s3 + $0x138] sm:$0xff] }
  0x17   :  { %2000 = vmatmul.msk.f32.vlgmr.msrb.gmra.mxu2 %vm133_vm1, %v2171_v20  ;;  %2002 = vmatmul.msk.f32.vlgmr.msrb.gmra.mxu3 %vm133_vm1, %v2171_v20  ;;  %v567_v63 = vld [vmem:[%s4323_s3 + $0x468] sm:$0xff]  ;;  %v564_v3 = vld [vmem:[%s4323_s3 + $0x450] sm:$0xff]  ;;  %v513_v6 = vld [vmem:[%s4323_s3 + $0x2b8] sm:$0xff] }
  0x18   :  { %269 = vmatpush.msrb.mxu0 %v49_v39  ;;  %289 = vmatpush.msrb.mxu1 %v50_v40  ;;  %v615_v0 = vld [vmem:[%s4323_s3 + $0x5e8] sm:$0xff]  ;;  %v612_v4 = vld [vmem:[%s4323_s3 + $0x5d0] sm:$0xff]  ;;  %v561_v7 = vld [vmem:[%s4323_s3 + $0x438] sm:$0xff] }
  0x19   :  { %1996 = vmatmul.msk.f32.vlgmr.msrb.gmra.mxu0 %vm133_vm1, %v2171_v20  ;;  %1998 = vmatmul.msk.f32.vlgmr.msrb.gmra.mxu1 %vm133_vm1, %v2171_v20  ;;  %v609_v8 = vld [vmem:[%s4323_s3 + $0x5b8] sm:$0xff]  ;;  %v462_v9 = vld [vmem:[%s4323_s3 + $0x120] sm:$0xff]  ;;  %v459_v13 = vld [vmem:[%s4323_s3 + $0x108] sm:$0xff] }
  0x1a   :  { %2003 = vmatpush.msk.msra.mxu0 %vm137_vm0, %v101_v41  ;;  %2007 = vmatpush.msk.msra.mxu2 %vm137_vm0, %v103_v42  ;;  %v510_v10 = vld [vmem:[%s4323_s3 + $0x2a0] sm:$0xff]  ;;  %v507_v14 = vld [vmem:[%s4323_s3 + $0x288] sm:$0xff]  ;;  %v456_v17 = vld [vmem:[%s4323_s3 + $0xf0] sm:$0xff] }
  0x1b   :  { %2005 = vmatpush.msk.msra.mxu1 %vm137_vm0, %v102_v43  ;;  %2009 = vmatpush.msk.msra.mxu3 %vm137_vm0, %v104_v44  ;;  %v558_v11 = vld [vmem:[%s4323_s3 + $0x420] sm:$0xff]  ;;  %v555_v15 = vld [vmem:[%s4323_s3 + $0x408] sm:$0xff]  ;;  %v504_v18 = vld [vmem:[%s4323_s3 + $0x270] sm:$0xff] }
  0x1c   :  { %346 = vmatpush.msra.mxu0 %v89_v45  ;;  %386 = vmatpush.msra.mxu2 %v91_v46  ;;  %v606_v12 = vld [vmem:[%s4323_s3 + $0x5a0] sm:$0xff]  ;;  %v603_v16 = vld [vmem:[%s4323_s3 + $0x588] sm:$0xff]  ;;  %v552_v19 = vld [vmem:[%s4323_s3 + $0x3f0] sm:$0xff] }
  0x1d   :  { %366 = vmatpush.msra.mxu1 %v90_v47  ;;  %406 = vmatpush.msra.mxu3 %v92_v48  ;;  %v453_v21 = vld [vmem:[%s4323_s3 + $0xd8] sm:$0xff]  ;;  %v450_v25 = vld [vmem:[%s4323_s3 + $0xc0] sm:$0xff]  ;;  %v447_v29 = vld [vmem:[%s4323_s3 + $0xa8] sm:$0xff] }
  0x1e   :  { %347 = vmatpush.msra.mxu0 %v77_v49  ;;  %387 = vmatpush.msra.mxu2 %v79_v50  ;;  %v501_v22 = vld [vmem:[%s4323_s3 + $0x258] sm:$0xff]  ;;  %v498_v26 = vld [vmem:[%s4323_s3 + $0x240] sm:$0xff]  ;;  %v495_v30 = vld [vmem:[%s4323_s3 + $0x228] sm:$0xff] }
  0x1f   :  { %367 = vmatpush.msra.mxu1 %v78_v51  ;;  %407 = vmatpush.msra.mxu3 %v80_v52  ;;  %v549_v23 = vld [vmem:[%s4323_s3 + $0x3d8] sm:$0xff]  ;;  %v546_v27 = vld [vmem:[%s4323_s3 + $0x3c0] sm:$0xff]  ;;  %v543_v31 = vld [vmem:[%s4323_s3 + $0x3a8] sm:$0xff] }
  0x20   :  { %348 = vmatpush.msra.mxu0 %v65_v53  ;;  %388 = vmatpush.msra.mxu2 %v67_v54  ;;  %v597_v24 = vld [vmem:[%s4323_s3 + $0x558] sm:$0xff]  ;;  %v594_v28 = vld [vmem:[%s4323_s3 + $0x540] sm:$0xff]  ;;  %v591_v32 = vld [vmem:[%s4323_s3 + $0x528] sm:$0xff] }
  0x21   :  { %368 = vmatpush.msra.mxu1 %v66_v55  ;;  %408 = vmatpush.msra.mxu3 %v68_v56  ;;  %v444_v33 = vld [vmem:[%s4323_s3 + $0x90] sm:$0xff]  ;;  %v441_v37 = vld [vmem:[%s4323_s3 + $0x78] sm:$0xff]  ;;  %v438_v41 = vld [vmem:[%s4323_s3 + $0x60] sm:$0xff] }
  0x22   :  { %349 = vmatpush.msra.mxu0 %v53_v57  ;;  %389 = vmatpush.msra.mxu2 %v55_v58  ;;  %v492_v34 = vld [vmem:[%s4323_s3 + $0x210] sm:$0xff]  ;;  %v489_v38 = vld [vmem:[%s4323_s3 + $0x1f8] sm:$0xff]  ;;  %v486_v42 = vld [vmem:[%s4323_s3 + $0x1e0] sm:$0xff] }
  0x23   :  { %2004 = vmatmul.msk.f32.vlgmr.msra.gmra.mxu0 %vm133_vm1, %v2171_v20  ;;  %2008 = vmatmul.msk.f32.vlgmr.msra.gmra.mxu2 %vm133_vm1, %v2171_v20  ;;  %v540_v35 = vld [vmem:[%s4323_s3 + $0x390] sm:$0xff]  ;;  %v537_v39 = vld [vmem:[%s4323_s3 + $0x378] sm:$0xff]  ;;  %v534_v43 = vld [vmem:[%s4323_s3 + $0x360] sm:$0xff] }
  0x24   :  { %369 = vmatpush.msra.mxu1 %v54_v59  ;;  %409 = vmatpush.msra.mxu3 %v56_v60  ;;  %v588_v36 = vld [vmem:[%s4323_s3 + $0x510] sm:$0xff]  ;;  %v585_v40 = vld [vmem:[%s4323_s3 + $0x4f8] sm:$0xff]  ;;  %v582_v44 = vld [vmem:[%s4323_s3 + $0x4e0] sm:$0xff] }
  0x25   :  { %2006 = vmatmul.msk.f32.vlgmr.msra.gmra.mxu1 %vm133_vm1, %v2171_v20  ;;  %2010 = vmatmul.msk.f32.vlgmr.msra.gmra.mxu3 %vm133_vm1, %v2171_v20  ;;  %v600_v20 = vld [vmem:[%s4323_s3 + $0x570] sm:$0xff]  ;;  %v435_v45 = vld [vmem:[%s4323_s3 + $0x48] sm:$0xff]  ;;  %v429_v53 = vld [vmem:[%s4323_s3 + $0x18] sm:$0xff] }
  0x26   :  { %1011 = vmatpush.msrb.mxu0 %v471_v61  ;;  %1031 = vmatpush.msrb.mxu1 %v519_v62  ;;  %v483_v46 = vld [vmem:[%s4323_s3 + $0x1c8] sm:$0xff]  ;;  %v432_v49 = vld [vmem:[%s4323_s3 + $0x30] sm:$0xff]  ;;  %v477_v54 = vld [vmem:[%s4323_s3 + $0x198] sm:$0xff] }
  0x27   :  { %1051 = vmatpush.msrb.mxu2 %v567_v63  ;;  %1071 = vmatpush.msrb.mxu3 %v615_v0  ;;  %v531_v47 = vld [vmem:[%s4323_s3 + $0x348] sm:$0xff]  ;;  %v480_v50 = vld [vmem:[%s4323_s3 + $0x1b0] sm:$0xff]  ;;  %v525_v55 = vld [vmem:[%s4323_s3 + $0x318] sm:$0xff] }
  0x28   :  { %1012 = vmatpush.msrb.mxu0 %v468_v1  ;;  %1032 = vmatpush.msrb.mxu1 %v516_v2  ;;  %v579_v48 = vld [vmem:[%s4323_s3 + $0x4c8] sm:$0xff]  ;;  %v528_v51 = vld [vmem:[%s4323_s3 + $0x330] sm:$0xff]  ;;  %v573_v56 = vld [vmem:[%s4323_s3 + $0x498] sm:$0xff] }
  0x29   :  { %1052 = vmatpush.msrb.mxu2 %v564_v3  ;;  %1072 = vmatpush.msrb.mxu3 %v612_v4  ;;  %v576_v52 = vld [vmem:[%s4323_s3 + $0x4b0] sm:$0xff]  ;;  %v426_v57 = vld [vmem:[%s4323_s3] sm:$0xff]  ;;  %v663_v59 = vld [vmem:[%s4323_s3 + $0x768] sm:$0xff] }
  0x2a   :  { %1013 = vmatpush.msrb.mxu0 %v465_v5  ;;  %1033 = vmatpush.msrb.mxu1 %v513_v6  ;;  %v474_v58 = vld [vmem:[%s4323_s3 + $0x180] sm:$0xff]  ;;  %v711_v60 = vld [vmem:[%s4323_s3 + $0x8e8] sm:$0xff]  ;;  %v660_v63 = vld [vmem:[%s4323_s3 + $0x750] sm:$0xff] }
  0x2b   :  { %1053 = vmatpush.msrb.mxu2 %v561_v7  ;;  %1073 = vmatpush.msrb.mxu3 %v609_v8  ;;  %v522_v61 = vld [vmem:[%s4323_s3 + $0x300] sm:$0xff]  ;;  %v708_v0 = vld [vmem:[%s4323_s3 + $0x8d0] sm:$0xff]  ;;  %v759_v1 = vld [vmem:[%s4323_s3 + $0xa68] sm:$0xff] }
  0x2c   :  { %1014 = vmatpush.msrb.mxu0 %v462_v9  ;;  %1034 = vmatpush.msrb.mxu1 %v510_v10  ;;  %v570_v62 = vld [vmem:[%s4323_s3 + $0x480] sm:$0xff]  ;;  %v807_v2 = vld [vmem:[%s4323_s3 + $0xbe8] sm:$0xff]  ;;  %v657_v3 = vld [vmem:[%s4323_s3 + $0x738] sm:$0xff] }
  0x2d   :  { %1054 = vmatpush.msrb.mxu2 %v558_v11  ;;  %1074 = vmatpush.msrb.mxu3 %v606_v12  ;;  %v705_v4 = vld [vmem:[%s4323_s3 + $0x8b8] sm:$0xff]  ;;  %v756_v5 = vld [vmem:[%s4323_s3 + $0xa50] sm:$0xff]  ;;  %v654_v7 = vld [vmem:[%s4323_s3 + $0x720] sm:$0xff] }
  0x2e   :  { %1015 = vmatpush.msrb.mxu0 %v459_v13  ;;  %1035 = vmatpush.msrb.mxu1 %v507_v14  ;;  %v804_v6 = vld [vmem:[%s4323_s3 + $0xbd0] sm:$0xff]  ;;  %v702_v8 = vld [vmem:[%s4323_s3 + $0x8a0] sm:$0xff]  ;;  %v753_v9 = vld [vmem:[%s4323_s3 + $0xa38] sm:$0xff] }
  0x2f   :  { %1055 = vmatpush.msrb.mxu2 %v555_v15  ;;  %1075 = vmatpush.msrb.mxu3 %v603_v16  ;;  %v801_v10 = vld [vmem:[%s4323_s3 + $0xbb8] sm:$0xff]  ;;  %v651_v11 = vld [vmem:[%s4323_s3 + $0x708] sm:$0xff]  ;;  %v750_v13 = vld [vmem:[%s4323_s3 + $0xa20] sm:$0xff] }
  0x30   :  { %1016 = vmatpush.msrb.mxu0 %v456_v17  ;;  %1036 = vmatpush.msrb.mxu1 %v504_v18  ;;  %v699_v12 = vld [vmem:[%s4323_s3 + $0x888] sm:$0xff]  ;;  %v798_v14 = vld [vmem:[%s4323_s3 + $0xba0] sm:$0xff]  ;;  %v648_v15 = vld [vmem:[%s4323_s3 + $0x6f0] sm:$0xff] }
  0x31   :  { %1056 = vmatpush.msrb.mxu2 %v552_v19  ;;  %1076 = vmatpush.msrb.mxu3 %v600_v20  ;;  %v696_v16 = vld [vmem:[%s4323_s3 + $0x870] sm:$0xff]  ;;  %v747_v17 = vld [vmem:[%s4323_s3 + $0xa08] sm:$0xff]  ;;  %v645_v19 = vld [vmem:[%s4323_s3 + $0x6d8] sm:$0xff] }
  0x32   :  { %1017 = vmatpush.msrb.mxu0 %v453_v21  ;;  %1037 = vmatpush.msrb.mxu1 %v501_v22  ;;  %v795_v18 = vld [vmem:[%s4323_s3 + $0xb88] sm:$0xff]  ;;  %v693_v20 = vld [vmem:[%s4323_s3 + $0x858] sm:$0xff]  ;;  %v744_v21 = vld [vmem:[%s4323_s3 + $0x9f0] sm:$0xff] }
  0x33   :  { %1057 = vmatpush.msrb.mxu2 %v549_v23  ;;  %1077 = vmatpush.msrb.mxu3 %v597_v24  ;;  %v792_v22 = vld [vmem:[%s4323_s3 + $0xb70] sm:$0xff]  ;;  %v642_v23 = vld [vmem:[%s4323_s3 + $0x6c0] sm:$0xff] }
  0x34   :  { %1018 = vmatpush.msrb.mxu0 %v450_v25  ;;  %1038 = vmatpush.msrb.mxu1 %v498_v26  ;;  %v690_v24 = vld [vmem:[%s4323_s3 + $0x840] sm:$0xff]  ;;  %v741_v25 = vld [vmem:[%s4323_s3 + $0x9d8] sm:$0xff] }
  0x35   :  { %1058 = vmatpush.msrb.mxu2 %v546_v27  ;;  %1078 = vmatpush.msrb.mxu3 %v594_v28  ;;  %v789_v26 = vld [vmem:[%s4323_s3 + $0xb58] sm:$0xff]  ;;  %v639_v27 = vld [vmem:[%s4323_s3 + $0x6a8] sm:$0xff] }
  0x36   :  { %1019 = vmatpush.msrb.mxu0 %v447_v29  ;;  %1039 = vmatpush.msrb.mxu1 %v495_v30  ;;  %v687_v28 = vld [vmem:[%s4323_s3 + $0x828] sm:$0xff]  ;;  %v738_v29 = vld [vmem:[%s4323_s3 + $0x9c0] sm:$0xff] }
  0x37   :  { %1059 = vmatpush.msrb.mxu2 %v543_v31  ;;  %1079 = vmatpush.msrb.mxu3 %v591_v32  ;;  %v786_v30 = vld [vmem:[%s4323_s3 + $0xb40] sm:$0xff]  ;;  %v636_v31 = vld [vmem:[%s4323_s3 + $0x690] sm:$0xff] }
  0x38   :  { %1020 = vmatpush.msrb.mxu0 %v444_v33  ;;  %1040 = vmatpush.msrb.mxu1 %v492_v34  ;;  %v684_v32 = vld [vmem:[%s4323_s3 + $0x810] sm:$0xff]  ;;  %v735_v33 = vld [vmem:[%s4323_s3 + $0x9a8] sm:$0xff] }
  0x39   :  { %1060 = vmatpush.msrb.mxu2 %v540_v35  ;;  %1080 = vmatpush.msrb.mxu3 %v588_v36  ;;  %v783_v34 = vld [vmem:[%s4323_s3 + $0xb28] sm:$0xff]  ;;  %v633_v35 = vld [vmem:[%s4323_s3 + $0x678] sm:$0xff] }
  0x3a   :  { %1021 = vmatpush.msrb.mxu0 %v441_v37  ;;  %1041 = vmatpush.msrb.mxu1 %v489_v38  ;;  %v681_v36 = vld [vmem:[%s4323_s3 + $0x7f8] sm:$0xff]  ;;  %v732_v37 = vld [vmem:[%s4323_s3 + $0x990] sm:$0xff] }
  0x3b   :  { %1061 = vmatpush.msrb.mxu2 %v537_v39  ;;  %1081 = vmatpush.msrb.mxu3 %v585_v40  ;;  %v780_v38 = vld [vmem:[%s4323_s3 + $0xb10] sm:$0xff]  ;;  %v630_v39 = vld [vmem:[%s4323_s3 + $0x660] sm:$0xff] }
  0x3c   :  { %1022 = vmatpush.msrb.mxu0 %v438_v41  ;;  %1042 = vmatpush.msrb.mxu1 %v486_v42  ;;  %v678_v40 = vld [vmem:[%s4323_s3 + $0x7e0] sm:$0xff]  ;;  %v627_v41 = vld [vmem:[%s4323_s3 + $0x648] sm:$0xff] }
  0x3d   :  { %1062 = vmatpush.msrb.mxu2 %v534_v43  ;;  %1082 = vmatpush.msrb.mxu3 %v582_v44  ;;  %v675_v42 = vld [vmem:[%s4323_s3 + $0x7c8] sm:$0xff]  ;;  %v624_v43 = vld [vmem:[%s4323_s3 + $0x630] sm:$0xff] }
  0x3e   :  { %1023 = vmatpush.msrb.mxu0 %v435_v45  ;;  %1043 = vmatpush.msrb.mxu1 %v483_v46  ;;  %v672_v44 = vld [vmem:[%s4323_s3 + $0x7b0] sm:$0xff]  ;;  %v729_v45 = vld [vmem:[%s4323_s3 + $0x978] sm:$0xff] }
  0x3f   :  { %1063 = vmatpush.msrb.mxu2 %v531_v47  ;;  %1083 = vmatpush.msrb.mxu3 %v579_v48  ;;  %v777_v46 = vld [vmem:[%s4323_s3 + $0xaf8] sm:$0xff] }
  0x40   :  { %1024 = vmatpush.msrb.mxu0 %v432_v49  ;;  %1044 = vmatpush.msrb.mxu1 %v480_v50  ;;  %v621_v47 = vld [vmem:[%s4323_s3 + $0x618] sm:$0xff]  ;;  %v726_v49 = vld [vmem:[%s4323_s3 + $0x960] sm:$0xff] }
  0x41   :  { %1064 = vmatpush.msrb.mxu2 %v528_v51  ;;  %1084 = vmatpush.msrb.mxu3 %v576_v52  ;;  %v669_v48 = vld [vmem:[%s4323_s3 + $0x798] sm:$0xff]  ;;  %v774_v50 = vld [vmem:[%s4323_s3 + $0xae0] sm:$0xff] }
  0x42   :  { %1025 = vmatpush.msrb.mxu0 %v429_v53  ;;  %1045 = vmatpush.msrb.mxu1 %v477_v54  ;;  %v618_v51 = vld [vmem:[%s4323_s3 + $0x600] sm:$0xff]  ;;  %v723_v53 = vld [vmem:[%s4323_s3 + $0x948] sm:$0xff] }
  0x43   :  { %1065 = vmatpush.msrb.mxu2 %v525_v55  ;;  %1085 = vmatpush.msrb.mxu3 %v573_v56  ;;  %v666_v52 = vld [vmem:[%s4323_s3 + $0x780] sm:$0xff]  ;;  %v771_v54 = vld [vmem:[%s4323_s3 + $0xac8] sm:$0xff]  ;;  %v720_v55 = vld [vmem:[%s4323_s3 + $0x930] sm:$0xff] }
  0x44   :  { %1026 = vmatpush.msrb.mxu0 %v426_v57  ;;  %1046 = vmatpush.msrb.mxu1 %v474_v58  ;;  %v768_v56 = vld [vmem:[%s4323_s3 + $0xab0] sm:$0xff]  ;;  %v717_v57 = vld [vmem:[%s4323_s3 + $0x918] sm:$0xff] }
  0x45   :  { %1066 = vmatpush.msrb.mxu2 %v522_v61  ;;  %1086 = vmatpush.msrb.mxu3 %v570_v62  ;;  %v765_v58 = vld [vmem:[%s4323_s3 + $0xa98] sm:$0xff]  ;;  %v2712_v61 = vld [vmem:[%s4324_s2] sm:$0xff] }
  0x46   :  { %1091 = vmatpush.msra.mxu0 %v663_v59  ;;  %1111 = vmatpush.msra.mxu1 %v711_v60  ;;  %v714_v59 = vld [vmem:[%s4323_s3 + $0x900] sm:$0xff]  ;;  %v109_v62 = vperm.slane %v2712_v61, 0 }
  0x47   :  { %1131 = vmatpush.msra.mxu2 %v759_v1  ;;  %1151 = vmatpush.msra.mxu3 %v807_v2  ;;  %v762_v60 = vld [vmem:[%s4323_s3 + $0xa80] sm:$0xff] }
  0x48   :  { %1092 = vmatpush.msra.mxu0 %v660_v63  ;;  %1112 = vmatpush.msra.mxu1 %v708_v0  ;;  %v110_v63 = vperm.slane %v2712_v61, 1 }
  0x49   :  { %1132 = vmatpush.msra.mxu2 %v756_v5  ;;  %1152 = vmatpush.msra.mxu3 %v804_v6  ;;  %v855_v6 = vld [vmem:[%s4323_s3 + $0xd68] sm:$0xff] }
  0x4a   :  { %1093 = vmatpush.msra.mxu0 %v657_v3  ;;  %1113 = vmatpush.msra.mxu1 %v705_v4 }
  0x4b   :  { %1133 = vmatpush.msra.mxu2 %v753_v9  ;;  %1153 = vmatpush.msra.mxu3 %v801_v10  ;;  %v112_v9 = vperm.slane %v2712_v61, 3  ;;  %v852_v10 = vld [vmem:[%s4323_s3 + $0xd50] sm:$0xff] }
  0x4c   :  { %1094 = vmatpush.msra.mxu0 %v654_v7  ;;  %1114 = vmatpush.msra.mxu1 %v702_v8  ;;  %v903_v7 = vld [vmem:[%s4323_s3 + $0xee8] sm:$0xff]  ;;  %v111_v8 = vperm.slane %v2712_v61, 2 }
  0x4d   :  { %1134 = vmatpush.msra.mxu2 %v750_v13  ;;  %1154 = vmatpush.msra.mxu3 %v798_v14  ;;  %v849_v14 = vld [vmem:[%s4323_s3 + $0xd38] sm:$0xff] }
  0x4e   :  { %1095 = vmatpush.msra.mxu0 %v651_v11  ;;  %1115 = vmatpush.msra.mxu1 %v699_v12  ;;  %v900_v11 = vld [vmem:[%s4323_s3 + $0xed0] sm:$0xff] }
  0x4f   :  { %1135 = vmatpush.msra.mxu2 %v747_v17  ;;  %1155 = vmatpush.msra.mxu3 %v795_v18 }
  0x50   :  { %1096 = vmatpush.msra.mxu0 %v648_v15  ;;  %1116 = vmatpush.msra.mxu1 %v696_v16  ;;  %v897_v15 = vld [vmem:[%s4323_s3 + $0xeb8] sm:$0xff] }
  0x51   :  { %1136 = vmatpush.msra.mxu2 %v744_v21  ;;  %1156 = vmatpush.msra.mxu3 %v792_v22  ;;  %v894_v21 = vld [vmem:[%s4323_s3 + $0xea0] sm:$0xff]  ;;  %v951_v22 = vld [vmem:[%s4323_s3 + $0x1068] sm:$0xff] }
  0x52   :  { %1097 = vmatpush.msra.mxu0 %v645_v19  ;;  %1117 = vmatpush.msra.mxu1 %v693_v20  ;;  %v846_v20 = vld [vmem:[%s4323_s3 + $0xd20] sm:$0xff] }
  0x53   :  { %1137 = vmatpush.msra.mxu2 %v741_v25  ;;  %1157 = vmatpush.msra.mxu3 %v789_v26  ;;  %v843_v25 = vld [vmem:[%s4323_s3 + $0xd08] sm:$0xff] }
  0x54   :  { %1098 = vmatpush.msra.mxu0 %v642_v23  ;;  %1118 = vmatpush.msra.mxu1 %v690_v24  ;;  %v987_v23 = vld [vmem:[%s4323_s3 + $0x1188] sm:$0xf]  ;;  %v113_v24 = vperm.slane %v2712_v61, 4 }
  0x55   :  { %1138 = vmatpush.msra.mxu2 %v738_v29  ;;  %1158 = vmatpush.msra.mxu3 %v786_v30  ;;  %v891_v26 = vld [vmem:[%s4323_s3 + $0xe88] sm:$0xff]  ;;  %v115_v30 = vperm.slane %v2712_v61, 6 }
  0x56   :  { %1099 = vmatpush.msra.mxu0 %v639_v27  ;;  %1119 = vmatpush.msra.mxu1 %v687_v28  ;;  %v948_v27 = vld [vmem:[%s4323_s3 + $0x1050] sm:$0xff] }
  0x57   :  { %1139 = vmatpush.msra.mxu2 %v735_v33  ;;  %1159 = vmatpush.msra.mxu3 %v783_v34  ;;  %v984_v28 = vld [vmem:[%s4323_s3 + $0x1170] sm:$0xff]  ;;  %v116_v33 = vperm.slane %v2712_v61, 7  ;;  %v114_v34 = vperm.slane %v2712_v61, 5 }
  0x58   :  { %1100 = vmatpush.msra.mxu0 %v636_v31  ;;  %1120 = vmatpush.msra.mxu1 %v684_v32  ;;  %v840_v31 = vld [vmem:[%s4323_s3 + $0xcf0] sm:$0xff] }
  0x59   :  { %1140 = vmatpush.msra.mxu2 %v732_v37  ;;  %1160 = vmatpush.msra.mxu3 %v780_v38  ;;  %v888_v32 = vld [vmem:[%s4323_s3 + $0xe70] sm:$0xff] }
  0x5a   :  { %1101 = vmatpush.msra.mxu0 %v633_v35  ;;  %1121 = vmatpush.msra.mxu1 %v681_v36  ;;  %v945_v35 = vld [vmem:[%s4323_s3 + $0x1038] sm:$0xff]  ;;  %v876_v61 = vld [vmem:[%s4323_s3 + $0xe10] sm:$0xff] }
  0x5b   :  { %1141 = vmatpush.msra.mxu2 %v729_v45  ;;  %1161 = vmatpush.msra.mxu3 %v777_v46  ;;  %v981_v36 = vld [vmem:[%s4323_s3 + $0x1158] sm:$0xff] }
  0x5c   :  { %1102 = vmatpush.msra.mxu0 %v630_v39  ;;  %1122 = vmatpush.msra.mxu1 %v678_v40  ;;  %v837_v39 = vld [vmem:[%s4323_s3 + $0xcd8] sm:$0xff] }
  0x5d   :  { %1142 = vmatpush.msra.mxu2 %v726_v49  ;;  %1162 = vmatpush.msra.mxu3 %v774_v50  ;;  %v885_v40 = vld [vmem:[%s4323_s3 + $0xe58] sm:$0xff]  ;;  %v882_v49 = vld [vmem:[%s4323_s3 + $0xe40] sm:$0xff] }
  0x5e   :  { %1103 = vmatpush.msra.mxu0 %v627_v41  ;;  %1123 = vmatpush.msra.mxu1 %v675_v42 }
  0x5f   :  { %1143 = vmatpush.msra.mxu2 %v723_v53  ;;  %1163 = vmatpush.msra.mxu3 %v771_v54  ;;  %v831_v54 = vld [vmem:[%s4323_s3 + $0xca8] sm:$0xff] }
  0x60   :  { %1104 = vmatpush.msra.mxu0 %v624_v43  ;;  %1124 = vmatpush.msra.mxu1 %v672_v44  ;;  %v942_v43 = vld [vmem:[%s4323_s3 + $0x1020] sm:$0xff] }
  0x61   :  { %1144 = vmatpush.msra.mxu2 %v720_v55  ;;  %1164 = vmatpush.msra.mxu3 %v768_v56  ;;  %v978_v44 = vld [vmem:[%s4323_s3 + $0x1140] sm:$0xff]  ;;  %v879_v55 = vld [vmem:[%s4323_s3 + $0xe28] sm:$0xff] }
  0x62   :  { %1105 = vmatpush.msra.mxu0 %v621_v47  ;;  %1125 = vmatpush.msra.mxu1 %v669_v48  ;;  %v834_v48 = vld [vmem:[%s4323_s3 + $0xcc0] sm:$0xff] }
  0x63   :  { %1145 = vmatpush.msra.mxu2 %v717_v57  ;;  %1165 = vmatpush.msra.mxu3 %v765_v58  ;;  %v936_v58 = vld [vmem:[%s4323_s3 + $0xff0] sm:$0xff] }
  0x64   :  { %1106 = vmatpush.msra.mxu0 %v618_v51  ;;  %1126 = vmatpush.msra.mxu1 %v666_v52  ;;  %v939_v51 = vld [vmem:[%s4323_s3 + $0x1008] sm:$0xff] }
  0x65   :  { %1146 = vmatpush.msra.mxu2 %v714_v59  ;;  %1166 = vmatpush.msra.mxu3 %v762_v60  ;;  %v975_v52 = vld [vmem:[%s4323_s3 + $0x1128] sm:$0xff]  ;;  %v972_v59 = vld [vmem:[%s4323_s3 + $0x1110] sm:$0xff] }
  0x66   :  { %v828_v60 = vld [vmem:[%s4323_s3 + $0xc90] sm:$0xff] }
  0x89   :  { %v191_v0 = vpop.f32.mrf.mxu0  ;;  %v211_v1 = vpop.f32.mrf.mxu1 }
  0x8a   :  { %v192_v2 = vadd.f32 %v191_v0, %v109_v62  ;;  %v212_v3 = vadd.f32 %v211_v1, %v110_v63  ;;  %v933_v62 = vld [vmem:[%s4323_s3 + $0xfd8] sm:$0xff] }
  0x8b   :  { %v969_v63 = vld [vmem:[%s4323_s3 + $0x10f8] sm:$0xff] }
  0x8c   :  { %v2716_v4 = vmax.f32 %v192_v2, 0.0  ;;  %v2718_v5 = vmax.f32 %v212_v3, 0.0  ;;  %v825_v0 = vld [vmem:[%s4323_s3 + $0xc78] sm:$0xff]  ;;  %v2858_v2 = vld [vmem:[%s4324_s2 + $0x8] sm:$0xf]  ;;  %v930_v3 = vld [vmem:[%s4323_s3 + $0xfc0] sm:$0xff] }
  0x8d   :  { %v873_v1 = vld [vmem:[%s4323_s3 + $0xdf8] sm:$0xff] }
  0x8e   :  { %1027 = vmatmul.f32.vlgmr.msrb.gmra.mxu0 %v2716_v4  ;;  %1047 = vmatmul.f32.vlgmr.msrb.gmra.mxu1 %v2718_v5 }
  0x8f   :  { %1171 = vmatpush.msrb.mxu0 %v855_v6  ;;  %1191 = vmatpush.msrb.mxu1 %v903_v7  ;;  %v966_v6 = vld [vmem:[%s4323_s3 + $0x10e0] sm:$0xff] }
  0x90   :  { %v231_v12 = vpop.f32.mrf.mxu2  ;;  %v251_v13 = vpop.f32.mrf.mxu3  ;;  %v822_v7 = vld [vmem:[%s4323_s3 + $0xc60] sm:$0xff] }
  0x91   :  { %v232_v16 = vadd.f32 %v231_v12, %v111_v8  ;;  %v252_v17 = vadd.f32 %v251_v13, %v112_v9  ;;  %1172 = vmatpush.msrb.mxu0 %v852_v10  ;;  %1192 = vmatpush.msrb.mxu1 %v900_v11  ;;  %v870_v8 = vld [vmem:[%s4323_s3 + $0xde0] sm:$0xff]  ;;  %v927_v9 = vld [vmem:[%s4323_s3 + $0xfa8] sm:$0xff]  ;;  %v117_v11 = vperm.slane %v2858_v2, 0 }
  0x92   :  { %v963_v10 = vld [vmem:[%s4323_s3 + $0x10c8] sm:$0xff] }
  0x93   :  { %v2742_v18 = vmax.f32 %v232_v16, 0.0  ;;  %v2744_v19 = vmax.f32 %v252_v17, 0.0  ;;  %1173 = vmatpush.msrb.mxu0 %v849_v14  ;;  %1193 = vmatpush.msrb.mxu1 %v897_v15  ;;  %v819_v12 = vld [vmem:[%s4323_s3 + $0xc48] sm:$0xff]  ;;  %v924_v15 = vld [vmem:[%s4323_s3 + $0xf90] sm:$0xff]  ;;  %v118_v17 = vperm.slane %v2858_v2, 1 }
  0x94   :  { %v867_v13 = vld [vmem:[%s4323_s3 + $0xdc8] sm:$0xff]  ;;  %v960_v16 = vld [vmem:[%s4323_s3 + $0x10b0] sm:$0xff] }
  0x95   :  { %1067 = vmatmul.f32.vlgmr.msrb.gmra.mxu2 %v2742_v18  ;;  %1087 = vmatmul.f32.vlgmr.msrb.gmra.mxu3 %v2744_v19 }
  0x96   :  { %1174 = vmatpush.msrb.mxu0 %v846_v20  ;;  %1194 = vmatpush.msrb.mxu1 %v894_v21  ;;  %v271_v29 = vpop.f32.mrf.mxu0  ;;  %v291_v38 = vpop.f32.mrf.mxu1  ;;  %v816_v20 = vld [vmem:[%s4323_s3 + $0xc30] sm:$0xff] }
  0x97   :  { %1211 = vmatpush.msrb.mxu2 %v951_v22  ;;  %2011 = vmatpush.msk.msrb.mxu3 %vm137_vm0, %v987_v23  ;;  %v272_v37 = vadd.f32 %v271_v29, %v113_v24  ;;  %v292_v47 = vadd.f32 %v291_v38, %v114_v34  ;;  %v864_v21 = vld [vmem:[%s4323_s3 + $0xdb0] sm:$0xff]  ;;  %v921_v24 = vld [vmem:[%s4323_s3 + $0xf78] sm:$0xff]  ;;  %v918_v29 = vld [vmem:[%s4323_s3 + $0xf60] sm:$0xff] }
  0x98   :  { %1175 = vmatpush.msrb.mxu0 %v843_v25  ;;  %1195 = vmatpush.msrb.mxu1 %v891_v26  ;;  %v957_v25 = vld [vmem:[%s4323_s3 + $0x1098] sm:$0xff] }
  0x99   :  { %1212 = vmatpush.msrb.mxu2 %v948_v27  ;;  %1236 = vmatpush.msrb.mxu3 %v984_v28  ;;  %v2807_v50 = vmax.f32 %v272_v37, 0.0  ;;  %v2825_v57 = vmax.f32 %v292_v47, 0.0  ;;  %v813_v26 = vld [vmem:[%s4323_s3 + $0xc18] sm:$0xff] }
  0x9a   :  { %v311_v41 = vpop.f32.mrf.mxu2  ;;  %1176 = vmatpush.msrb.mxu0 %v840_v31  ;;  %1196 = vmatpush.msrb.mxu1 %v888_v32  ;;  %v331_v42 = vpop.f32.mrf.mxu3  ;;  %v861_v27 = vld [vmem:[%s4323_s3 + $0xd98] sm:$0xff]  ;;  %v472_v31 = vld [vmem:[%s4323_s3 + $0x170] sm:$0xff]  ;;  %v810_v32 = vld [vmem:[%s4323_s3 + $0xc00] sm:$0xff] }
  0x9b   :  { %v312_v45 = vadd.f32 %v311_v41, %v115_v30  ;;  %1213 = vmatpush.msrb.mxu2 %v945_v35  ;;  %1237 = vmatpush.msrb.mxu3 %v981_v36  ;;  %v332_v46 = vadd.f32 %v331_v42, %v116_v33  ;;  %v954_v30 = vld [vmem:[%s4323_s3 + $0x1080] sm:$0xff]  ;;  %v119_v33 = vperm.slane %v2858_v2, 2  ;;  %v915_v36 = vld [vmem:[%s4323_s3 + $0xf48] sm:$0xff]  ;;  %v469_v38 = vld [vmem:[%s4323_s3 + $0x158] sm:$0xff] }
  0x9c   :  { %1177 = vmatpush.msrb.mxu0 %v837_v39  ;;  %1197 = vmatpush.msrb.mxu1 %v885_v40  ;;  %v858_v35 = vld [vmem:[%s4323_s3 + $0xd80] sm:$0xff]  ;;  %v120_v39 = vperm.slane %v2858_v2, 3  ;;  %v520_v41 = vld [vmem:[%s4323_s3 + $0x2f0] sm:$0xff]  ;;  %v517_v47 = vld [vmem:[%s4323_s3 + $0x2d8] sm:$0xff] }
  0x9d   :  { %v2815_v53 = vmax.f32 %v312_v45, 0.0  ;;  %1214 = vmatpush.msrb.mxu2 %v942_v43  ;;  %1238 = vmatpush.msrb.mxu3 %v978_v44  ;;  %v2823_v56 = vmax.f32 %v332_v46, 0.0  ;;  %v568_v42 = vld [vmem:[%s4323_s3 + $0x470] sm:$0xff]  ;;  %v466_v46 = vld [vmem:[%s4323_s3 + $0x140] sm:$0xff] }
  0x9e   :  { %1178 = vmatpush.msrb.mxu0 %v834_v48  ;;  %1198 = vmatpush.msrb.mxu1 %v882_v49  ;;  %v912_v45 = vld [vmem:[%s4323_s3 + $0xf30] sm:$0xff]  ;;  %v565_v48 = vld [vmem:[%s4323_s3 + $0x458] sm:$0xff] }
  0x9f   :  { %1215 = vmatpush.msrb.mxu2 %v939_v51  ;;  %1239 = vmatpush.msrb.mxu3 %v975_v52  ;;  %v909_v51 = vld [vmem:[%s4323_s3 + $0xf18] sm:$0xff]  ;;  %v463_v52 = vld [vmem:[%s4323_s3 + $0x128] sm:$0xff]  ;;  %v508_v2 = vld [vmem:[%s4323_s3 + $0x290] sm:$0xff] }
  0xa0   :  { %1147 = vmatmul.f32.vlgmr.msra.gmra.mxu2 %v2815_v53  ;;  %1107 = vmatmul.f32.vlgmr.msra.gmra.mxu0 %v2807_v50  ;;  %v351_v14 = vpop.f32.mrf.mxu0 }
  0xa1   :  { %1179 = vmatpush.msrb.mxu0 %v831_v54  ;;  %1199 = vmatpush.msrb.mxu1 %v879_v55  ;;  %v352_v23 = vadd.f32 %v351_v14, %v117_v11  ;;  %v514_v54 = vld [vmem:[%s4323_s3 + $0x2c0] sm:$0xff]  ;;  %v451_v11 = vld [vmem:[%s4323_s3 + $0xc8] sm:$0xff] }
  0xa2   :  { %1216 = vmatpush.msrb.mxu2 %v936_v58  ;;  %1240 = vmatpush.msrb.mxu3 %v972_v59  ;;  %v371_v22 = vpop.f32.mrf.mxu1  ;;  %v562_v58 = vld [vmem:[%s4323_s3 + $0x440] sm:$0xff]  ;;  %v607_v14 = vld [vmem:[%s4323_s3 + $0x5a8] sm:$0xff] }
  0xa3   :  { %1167 = vmatmul.f32.vlgmr.msra.gmra.mxu3 %v2823_v56  ;;  %1127 = vmatmul.f32.vlgmr.msra.gmra.mxu1 %v2825_v57  ;;  %v372_v28 = vadd.f32 %v371_v22, %v118_v17  ;;  %v2923_v34 = vmax.f32 %v352_v23, 0.0  ;;  %v906_v59 = vld [vmem:[%s4323_s3 + $0xf00] sm:$0xff]  ;;  %v547_v17 = vld [vmem:[%s4323_s3 + $0x3c8] sm:$0xff]  ;;  %v496_v22 = vld [vmem:[%s4323_s3 + $0x230] sm:$0xff] }
  0xa4   :  { %1180 = vmatpush.msrb.mxu0 %v828_v60  ;;  %1200 = vmatpush.msrb.mxu1 %v876_v61  ;;  %v460_v60 = vld [vmem:[%s4323_s3 + $0x110] sm:$0xff] }
  0xa5   :  { %1217 = vmatpush.msrb.mxu2 %v933_v62  ;;  %1241 = vmatpush.msrb.mxu3 %v969_v63  ;;  %v2935_v40 = vmax.f32 %v372_v28, 0.0  ;;  %v511_v62 = vld [vmem:[%s4323_s3 + $0x2a8] sm:$0xff]  ;;  %v544_v23 = vld [vmem:[%s4323_s3 + $0x3b0] sm:$0xff]  ;;  %v598_v28 = vld [vmem:[%s4323_s3 + $0x560] sm:$0xff] }
  0xa6   :  { %1181 = vmatpush.msrb.mxu0 %v825_v0  ;;  %1201 = vmatpush.msrb.mxu1 %v873_v1  ;;  %v391_v37 = vpop.f32.mrf.mxu2  ;;  %v559_v63 = vld [vmem:[%s4323_s3 + $0x428] sm:$0xff]  ;;  %v616_v0 = vld [vmem:[%s4323_s3 + $0x5f0] sm:$0xff]  ;;  %v457_v1 = vld [vmem:[%s4323_s3 + $0xf8] sm:$0xff] }
  0xa7   :  { %1218 = vmatpush.msrb.mxu2 %v930_v3  ;;  %1242 = vmatpush.msrb.mxu3 %v966_v6  ;;  %v392_v44 = vadd.f32 %v391_v37, %v119_v33  ;;  %v556_v3 = vld [vmem:[%s4323_s3 + $0x410] sm:$0xff]  ;;  %v613_v6 = vld [vmem:[%s4323_s3 + $0x5d8] sm:$0xff] }
  0xa8   :  { %1182 = vmatpush.msrb.mxu0 %v822_v7  ;;  %1202 = vmatpush.msrb.mxu1 %v870_v8  ;;  %v411_v43 = vpop.f32.mrf.mxu3  ;;  %v454_v7 = vld [vmem:[%s4323_s3 + $0xe0] sm:$0xff]  ;;  %v505_v8 = vld [vmem:[%s4323_s3 + $0x278] sm:$0xff]  ;;  %v436_v33 = vld [vmem:[%s4323_s3 + $0x50] sm:$0xff] }
  0xa9   :  { %1219 = vmatpush.msrb.mxu2 %v927_v9  ;;  %1243 = vmatpush.msrb.mxu3 %v963_v10  ;;  %v412_v49 = vadd.f32 %v411_v43, %v120_v39  ;;  %v2966_v55 = vmax.f32 %v392_v44, 0.0  ;;  %v553_v9 = vld [vmem:[%s4323_s3 + $0x3f8] sm:$0xff]  ;;  %v610_v10 = vld [vmem:[%s4323_s3 + $0x5c0] sm:$0xff]  ;;  %v592_v37 = vld [vmem:[%s4323_s3 + $0x530] sm:$0xff] }
  0xaa   :  { %1183 = vmatpush.msrb.mxu0 %v819_v12  ;;  %1203 = vmatpush.msrb.mxu1 %v867_v13  ;;  %v502_v12 = vld [vmem:[%s4323_s3 + $0x260] sm:$0xff]  ;;  %v484_v39 = vld [vmem:[%s4323_s3 + $0x1d0] sm:$0xff]  ;;  %v481_v44 = vld [vmem:[%s4323_s3 + $0x1b8] sm:$0xff] }
  0xab   :  { %1220 = vmatpush.msrb.mxu2 %v924_v15  ;;  %1244 = vmatpush.msrb.mxu3 %v960_v16  ;;  %v2977_v61 = vmax.f32 %v412_v49, 0.0  ;;  %v550_v13 = vld [vmem:[%s4323_s3 + $0x3e0] sm:$0xff]  ;;  %v448_v15 = vld [vmem:[%s4323_s3 + $0xb0] sm:$0xff]  ;;  %v499_v16 = vld [vmem:[%s4323_s3 + $0x248] sm:$0xff] }
  0xac   :  { %1184 = vmatpush.msrb.mxu0 %v816_v20  ;;  %1204 = vmatpush.msrb.mxu1 %v864_v21  ;;  %v604_v20 = vld [vmem:[%s4323_s3 + $0x590] sm:$0xff]  ;;  %v445_v21 = vld [vmem:[%s4323_s3 + $0x98] sm:$0xff]  ;;  %v430_v43 = vld [vmem:[%s4323_s3 + $0x20] sm:$0xff] }
  0xad   :  { %1221 = vmatpush.msrb.mxu2 %v921_v24  ;;  %1245 = vmatpush.msrb.mxu3 %v957_v25  ;;  %v601_v24 = vld [vmem:[%s4323_s3 + $0x578] sm:$0xff]  ;;  %v442_v25 = vld [vmem:[%s4323_s3 + $0x80] sm:$0xff] }
  0xae   :  { %1185 = vmatpush.msrb.mxu0 %v813_v26  ;;  %1205 = vmatpush.msrb.mxu1 %v861_v27  ;;  %v493_v26 = vld [vmem:[%s4323_s3 + $0x218] sm:$0xff]  ;;  %v526_v49 = vld [vmem:[%s4323_s3 + $0x320] sm:$0xff] }
  0xaf   :  { %1222 = vmatpush.msrb.mxu2 %v918_v29  ;;  %1246 = vmatpush.msrb.mxu3 %v954_v30  ;;  %v541_v27 = vld [vmem:[%s4323_s3 + $0x398] sm:$0xff]  ;;  %v439_v29 = vld [vmem:[%s4323_s3 + $0x68] sm:$0xff]  ;;  %v490_v30 = vld [vmem:[%s4323_s3 + $0x200] sm:$0xff] }
  0xb0   :  { %1186 = vmatpush.msrb.mxu0 %v810_v32  ;;  %1206 = vmatpush.msrb.mxu1 %v858_v35  ;;  %v595_v32 = vld [vmem:[%s4323_s3 + $0x548] sm:$0xff] }
  0xb1   :  { %1251 = vmatpush.msra.mxu3 %v472_v31  ;;  %1223 = vmatpush.msrb.mxu2 %v915_v36  ;;  %v538_v31 = vld [vmem:[%s4323_s3 + $0x380] sm:$0xff]  ;;  %v487_v35 = vld [vmem:[%s4323_s3 + $0x1e8] sm:$0xff] }
  0xb2   :  { %1187 = vmatmul.f32.vlgmr.msrb.gmra.mxu0 %v2923_v34  ;;  %1291 = vmatpush.msra.mxu1 %v568_v42  ;;  %v535_v36 = vld [vmem:[%s4323_s3 + $0x368] sm:$0xff]  ;;  %v589_v42 = vld [vmem:[%s4323_s3 + $0x518] sm:$0xff] }
  0xb3   :  { %1252 = vmatpush.msra.mxu3 %v469_v38  ;;  %1271 = vmatpush.msra.mxu0 %v520_v41  ;;  %v433_v38 = vld [vmem:[%s4323_s3 + $0x38] sm:$0xff]  ;;  %v532_v41 = vld [vmem:[%s4323_s3 + $0x350] sm:$0xff] }
  0xb4   :  { %1224 = vmatpush.msrb.mxu2 %v912_v45  ;;  %1207 = vmatmul.f32.vlgmr.msrb.gmra.mxu1 %v2935_v40  ;;  %v529_v45 = vld [vmem:[%s4323_s3 + $0x338] sm:$0xff] }
  0xb5   :  { %1253 = vmatpush.msra.mxu3 %v466_v46  ;;  %1272 = vmatpush.msra.mxu0 %v517_v47  ;;  %v586_v46 = vld [vmem:[%s4323_s3 + $0x500] sm:$0xff]  ;;  %v427_v47 = vld [vmem:[%s4323_s3 + $0x8] sm:$0xff] }
  0xb6   :  { %1292 = vmatpush.msra.mxu1 %v565_v48  ;;  %1225 = vmatpush.msrb.mxu2 %v909_v51  ;;  %v478_v48 = vld [vmem:[%s4323_s3 + $0x1a0] sm:$0xff]  ;;  %v583_v51 = vld [vmem:[%s4323_s3 + $0x4e8] sm:$0xff] }
  0xb7   :  { %1254 = vmatpush.msra.mxu3 %v463_v52  ;;  %1273 = vmatpush.msra.mxu0 %v514_v54  ;;  %v475_v52 = vld [vmem:[%s4323_s3 + $0x188] sm:$0xff]  ;;  %v664_v54 = vld [vmem:[%s4323_s3 + $0x770] sm:$0xff] }
  0xb8   :  { %1293 = vmatpush.msra.mxu1 %v562_v58  ;;  %1226 = vmatpush.msrb.mxu2 %v906_v59  ;;  %v523_v58 = vld [vmem:[%s4323_s3 + $0x308] sm:$0xff]  ;;  %v580_v59 = vld [vmem:[%s4323_s3 + $0x4d0] sm:$0xff] }
  0xb9   :  { %1227 = vmatmul.f32.vlgmr.msrb.gmra.mxu2 %v2966_v55  ;;  %1255 = vmatpush.msra.mxu3 %v460_v60  ;;  %v661_v60 = vld [vmem:[%s4323_s3 + $0x758] sm:$0xff] }
  0xba   :  { %1274 = vmatpush.msra.mxu0 %v511_v62  ;;  %1294 = vmatpush.msra.mxu1 %v559_v63  ;;  %v712_v62 = vld [vmem:[%s4323_s3 + $0x8f0] sm:$0xff] }
  0xbb   :  { %1311 = vmatpush.msra.mxu2 %v616_v0  ;;  %2012 = vmatmul.msk.f32.vlgmr.msrb.gmra.mxu3 %vm998_vm2, %v2977_v61  ;;  %v760_v63 = vld [vmem:[%s4323_s3 + $0xa70] sm:$0xff]  ;;  %v577_v0 = vld [vmem:[%s4323_s3 + $0x4b8] sm:$0xff] }
  0xbc   :  { %1256 = vmatpush.msra.mxu3 %v457_v1  ;;  %1275 = vmatpush.msra.mxu0 %v508_v2  ;;  %v658_v1 = vld [vmem:[%s4323_s3 + $0x740] sm:$0xff]  ;;  %v709_v2 = vld [vmem:[%s4323_s3 + $0x8d8] sm:$0xff] }
  0xbd   :  { %1295 = vmatpush.msra.mxu1 %v556_v3  ;;  %1312 = vmatpush.msra.mxu2 %v613_v6  ;;  %v757_v3 = vld [vmem:[%s4323_s3 + $0xa58] sm:$0xff]  ;;  %v574_v6 = vld [vmem:[%s4323_s3 + $0x4a0] sm:$0xff] }
  0xbe   :  { %1257 = vmatpush.msra.mxu3 %v454_v7  ;;  %1276 = vmatpush.msra.mxu0 %v505_v8  ;;  %v655_v7 = vld [vmem:[%s4323_s3 + $0x728] sm:$0xff]  ;;  %v706_v8 = vld [vmem:[%s4323_s3 + $0x8c0] sm:$0xff] }
  0xbf   :  { %1296 = vmatpush.msra.mxu1 %v553_v9  ;;  %1313 = vmatpush.msra.mxu2 %v610_v10  ;;  %v754_v9 = vld [vmem:[%s4323_s3 + $0xa40] sm:$0xff]  ;;  %v571_v10 = vld [vmem:[%s4323_s3 + $0x488] sm:$0xff] }
  0xc0   :  { %1258 = vmatpush.msra.mxu3 %v451_v11  ;;  %1277 = vmatpush.msra.mxu0 %v502_v12  ;;  %v652_v11 = vld [vmem:[%s4323_s3 + $0x710] sm:$0xff]  ;;  %v703_v12 = vld [vmem:[%s4323_s3 + $0x8a8] sm:$0xff] }
  0xc1   :  { %1297 = vmatpush.msra.mxu1 %v550_v13  ;;  %1314 = vmatpush.msra.mxu2 %v607_v14  ;;  %v751_v13 = vld [vmem:[%s4323_s3 + $0xa28] sm:$0xff]  ;;  %v808_v14 = vld [vmem:[%s4323_s3 + $0xbf0] sm:$0xff] }
  0xc2   :  { %1259 = vmatpush.msra.mxu3 %v448_v15  ;;  %1278 = vmatpush.msra.mxu0 %v499_v16  ;;  %v649_v15 = vld [vmem:[%s4323_s3 + $0x6f8] sm:$0xff]  ;;  %v700_v16 = vld [vmem:[%s4323_s3 + $0x890] sm:$0xff] }
  0xc3   :  { %1298 = vmatpush.msra.mxu1 %v547_v17  ;;  %1315 = vmatpush.msra.mxu2 %v604_v20  ;;  %v748_v17 = vld [vmem:[%s4323_s3 + $0xa10] sm:$0xff]  ;;  %v805_v20 = vld [vmem:[%s4323_s3 + $0xbd8] sm:$0xff] }
  0xc4   :  { %1260 = vmatpush.msra.mxu3 %v445_v21  ;;  %1279 = vmatpush.msra.mxu0 %v496_v22  ;;  %v646_v21 = vld [vmem:[%s4323_s3 + $0x6e0] sm:$0xff]  ;;  %v697_v22 = vld [vmem:[%s4323_s3 + $0x878] sm:$0xff] }
  0xc5   :  { %1299 = vmatpush.msra.mxu1 %v544_v23  ;;  %1316 = vmatpush.msra.mxu2 %v601_v24  ;;  %v745_v23 = vld [vmem:[%s4323_s3 + $0x9f8] sm:$0xff]  ;;  %v802_v24 = vld [vmem:[%s4323_s3 + $0xbc0] sm:$0xff] }
  0xc6   :  { %1261 = vmatpush.msra.mxu3 %v442_v25  ;;  %1280 = vmatpush.msra.mxu0 %v493_v26  ;;  %v643_v25 = vld [vmem:[%s4323_s3 + $0x6c8] sm:$0xff]  ;;  %v694_v26 = vld [vmem:[%s4323_s3 + $0x860] sm:$0xff] }
  0xc7   :  { %1300 = vmatpush.msra.mxu1 %v541_v27  ;;  %1317 = vmatpush.msra.mxu2 %v598_v28  ;;  %v742_v27 = vld [vmem:[%s4323_s3 + $0x9e0] sm:$0xff]  ;;  %v799_v28 = vld [vmem:[%s4323_s3 + $0xba8] sm:$0xff] }
  0xc8   :  { %1262 = vmatpush.msra.mxu3 %v439_v29  ;;  %1281 = vmatpush.msra.mxu0 %v490_v30  ;;  %v640_v29 = vld [vmem:[%s4323_s3 + $0x6b0] sm:$0xff]  ;;  %v691_v30 = vld [vmem:[%s4323_s3 + $0x848] sm:$0xff] }
  0xc9   :  { %1301 = vmatpush.msra.mxu1 %v538_v31  ;;  %1318 = vmatpush.msra.mxu2 %v595_v32  ;;  %v739_v31 = vld [vmem:[%s4323_s3 + $0x9c8] sm:$0xff]  ;;  %v796_v32 = vld [vmem:[%s4323_s3 + $0xb90] sm:$0xff] }
  0xca   :  { %1263 = vmatpush.msra.mxu3 %v436_v33  ;;  %1282 = vmatpush.msra.mxu0 %v487_v35  ;;  %v637_v33 = vld [vmem:[%s4323_s3 + $0x698] sm:$0xff]  ;;  %v688_v35 = vld [vmem:[%s4323_s3 + $0x830] sm:$0xff] }
  0xcb   :  { %1302 = vmatpush.msra.mxu1 %v535_v36  ;;  %1319 = vmatpush.msra.mxu2 %v592_v37  ;;  %v736_v36 = vld [vmem:[%s4323_s3 + $0x9b0] sm:$0xff]  ;;  %v793_v37 = vld [vmem:[%s4323_s3 + $0xb78] sm:$0xff] }
  0xcc   :  { %1264 = vmatpush.msra.mxu3 %v433_v38  ;;  %1283 = vmatpush.msra.mxu0 %v484_v39  ;;  %v634_v38 = vld [vmem:[%s4323_s3 + $0x680] sm:$0xff]  ;;  %v685_v39 = vld [vmem:[%s4323_s3 + $0x818] sm:$0xff] }
  0xcd   :  { %1303 = vmatpush.msra.mxu1 %v532_v41  ;;  %1320 = vmatpush.msra.mxu2 %v589_v42  ;;  %v733_v41 = vld [vmem:[%s4323_s3 + $0x998] sm:$0xff]  ;;  %v790_v42 = vld [vmem:[%s4323_s3 + $0xb60] sm:$0xff] }
  0xce   :  { %1265 = vmatpush.msra.mxu3 %v430_v43  ;;  %1284 = vmatpush.msra.mxu0 %v481_v44  ;;  %v631_v43 = vld [vmem:[%s4323_s3 + $0x668] sm:$0xff]  ;;  %v682_v44 = vld [vmem:[%s4323_s3 + $0x800] sm:$0xff] }
  0xcf   :  { %1304 = vmatpush.msra.mxu1 %v529_v45  ;;  %1321 = vmatpush.msra.mxu2 %v586_v46  ;;  %v730_v45 = vld [vmem:[%s4323_s3 + $0x980] sm:$0xff]  ;;  %v787_v46 = vld [vmem:[%s4323_s3 + $0xb48] sm:$0xff] }
  0xd0   :  { %1266 = vmatpush.msra.mxu3 %v427_v47  ;;  %1285 = vmatpush.msra.mxu0 %v478_v48  ;;  %v628_v47 = vld [vmem:[%s4323_s3 + $0x650] sm:$0xff]  ;;  %v679_v48 = vld [vmem:[%s4323_s3 + $0x7e8] sm:$0xff] }
  0xd1   :  { %1305 = vmatpush.msra.mxu1 %v526_v49  ;;  %1322 = vmatpush.msra.mxu2 %v583_v51  ;;  %v727_v49 = vld [vmem:[%s4323_s3 + $0x968] sm:$0xff]  ;;  %v784_v51 = vld [vmem:[%s4323_s3 + $0xb30] sm:$0xff] }
  0xd2   :  { %1267 = vmatmul.f32.vlgmr.msra.gmra.mxu3 %v2716_v4  ;;  %1286 = vmatpush.msra.mxu0 %v475_v52  ;;  %v625_v52 = vld [vmem:[%s4323_s3 + $0x638] sm:$0xff] }
  0xd3   :  { %1331 = vmatpush.msrb.mxu3 %v664_v54  ;;  %1306 = vmatpush.msra.mxu1 %v523_v58  ;;  %v676_v54 = vld [vmem:[%s4323_s3 + $0x7d0] sm:$0xff] }
  0xd4   :  { %1323 = vmatpush.msra.mxu2 %v580_v59  ;;  %1287 = vmatmul.f32.vlgmr.msra.gmra.mxu0 %v2718_v5  ;;  %v724_v58 = vld [vmem:[%s4323_s3 + $0x950] sm:$0xff]  ;;  %v781_v59 = vld [vmem:[%s4323_s3 + $0xb18] sm:$0xff] }
  0xd5   :  { %1307 = vmatmul.f32.vlgmr.msra.gmra.mxu1 %v2742_v18  ;;  %1332 = vmatpush.msrb.mxu3 %v661_v60  ;;  %v622_v60 = vld [vmem:[%s4323_s3 + $0x620] sm:$0xff] }
  0xd6   :  { %1351 = vmatpush.msrb.mxu0 %v712_v62  ;;  %1371 = vmatpush.msrb.mxu1 %v760_v63  ;;  %v673_v62 = vld [vmem:[%s4323_s3 + $0x7b8] sm:$0xff] }
  0xd7   :  { %1324 = vmatpush.msra.mxu2 %v577_v0  ;;  %1333 = vmatpush.msrb.mxu3 %v658_v1  ;;  %v721_v63 = vld [vmem:[%s4323_s3 + $0x938] sm:$0xff]  ;;  %v778_v0 = vld [vmem:[%s4323_s3 + $0xb00] sm:$0xff]  ;;  %v619_v1 = vld [vmem:[%s4323_s3 + $0x608] sm:$0xff] }
  0xd8   :  { %1352 = vmatpush.msrb.mxu0 %v709_v2  ;;  %1372 = vmatpush.msrb.mxu1 %v757_v3  ;;  %v670_v2 = vld [vmem:[%s4323_s3 + $0x7a0] sm:$0xff] }
  0xd9   :  { %1325 = vmatpush.msra.mxu2 %v574_v6  ;;  %1334 = vmatpush.msrb.mxu3 %v655_v7  ;;  %v718_v3 = vld [vmem:[%s4323_s3 + $0x920] sm:$0xff]  ;;  %v775_v6 = vld [vmem:[%s4323_s3 + $0xae8] sm:$0xff] }
  0xda   :  { %1353 = vmatpush.msrb.mxu0 %v706_v8  ;;  %1373 = vmatpush.msrb.mxu1 %v754_v9  ;;  %v667_v7 = vld [vmem:[%s4323_s3 + $0x788] sm:$0xff]  ;;  %v856_v8 = vld [vmem:[%s4323_s3 + $0xd70] sm:$0xff] }
  0xdb   :  { %1326 = vmatpush.msra.mxu2 %v571_v10  ;;  %1335 = vmatpush.msrb.mxu3 %v652_v11  ;;  %v715_v9 = vld [vmem:[%s4323_s3 + $0x908] sm:$0xff]  ;;  %v772_v10 = vld [vmem:[%s4323_s3 + $0xad0] sm:$0xff]  ;;  %v853_v11 = vld [vmem:[%s4323_s3 + $0xd58] sm:$0xff] }
  0xdc   :  { %1327 = vmatmul.f32.vlgmr.msra.gmra.mxu2 %v2744_v19  ;;  %1354 = vmatpush.msrb.mxu0 %v703_v12  ;;  %v904_v12 = vld [vmem:[%s4323_s3 + $0xef0] sm:$0xff] }
  0xdd   :  { %1374 = vmatpush.msrb.mxu1 %v751_v13  ;;  %1391 = vmatpush.msrb.mxu2 %v808_v14  ;;  %v952_v13 = vld [vmem:[%s4323_s3 + $0x1070] sm:$0xff]  ;;  %v769_v14 = vld [vmem:[%s4323_s3 + $0xab8] sm:$0xff] }
  0xde   :  { %1336 = vmatpush.msrb.mxu3 %v649_v15  ;;  %1355 = vmatpush.msrb.mxu0 %v700_v16  ;;  %v850_v15 = vld [vmem:[%s4323_s3 + $0xd40] sm:$0xff]  ;;  %v901_v16 = vld [vmem:[%s4323_s3 + $0xed8] sm:$0xff] }
  0xdf   :  { %1375 = vmatpush.msrb.mxu1 %v748_v17  ;;  %1392 = vmatpush.msrb.mxu2 %v805_v20  ;;  %v949_v17 = vld [vmem:[%s4323_s3 + $0x1058] sm:$0xff]  ;;  %v766_v20 = vld [vmem:[%s4323_s3 + $0xaa0] sm:$0xff] }
  0xe0   :  { %1337 = vmatpush.msrb.mxu3 %v646_v21  ;;  %1356 = vmatpush.msrb.mxu0 %v697_v22  ;;  %v847_v21 = vld [vmem:[%s4323_s3 + $0xd28] sm:$0xff]  ;;  %v898_v22 = vld [vmem:[%s4323_s3 + $0xec0] sm:$0xff] }
  0xe1   :  { %1376 = vmatpush.msrb.mxu1 %v745_v23  ;;  %1393 = vmatpush.msrb.mxu2 %v802_v24  ;;  %v946_v23 = vld [vmem:[%s4323_s3 + $0x1040] sm:$0xff]  ;;  %v763_v24 = vld [vmem:[%s4323_s3 + $0xa88] sm:$0xff] }
  0xe2   :  { %1338 = vmatpush.msrb.mxu3 %v643_v25  ;;  %1357 = vmatpush.msrb.mxu0 %v694_v26  ;;  %v844_v25 = vld [vmem:[%s4323_s3 + $0xd10] sm:$0xff]  ;;  %v895_v26 = vld [vmem:[%s4323_s3 + $0xea8] sm:$0xff] }
  0xe3   :  { %1377 = vmatpush.msrb.mxu1 %v742_v27  ;;  %1394 = vmatpush.msrb.mxu2 %v799_v28  ;;  %v943_v27 = vld [vmem:[%s4323_s3 + $0x1028] sm:$0xff]  ;;  %v988_v28 = vld [vmem:[%s4323_s3 + $0x1190] sm:$0xf] }
  0xe4   :  { %1339 = vmatpush.msrb.mxu3 %v640_v29  ;;  %1358 = vmatpush.msrb.mxu0 %v691_v30  ;;  %v841_v29 = vld [vmem:[%s4323_s3 + $0xcf8] sm:$0xff]  ;;  %v892_v30 = vld [vmem:[%s4323_s3 + $0xe90] sm:$0xff] }
  0xe5   :  { %1378 = vmatpush.msrb.mxu1 %v739_v31  ;;  %1395 = vmatpush.msrb.mxu2 %v796_v32  ;;  %v940_v31 = vld [vmem:[%s4323_s3 + $0x1010] sm:$0xff]  ;;  %v985_v32 = vld [vmem:[%s4323_s3 + $0x1178] sm:$0xff] }
  0xe6   :  { %1340 = vmatpush.msrb.mxu3 %v637_v33  ;;  %1359 = vmatpush.msrb.mxu0 %v688_v35  ;;  %v838_v33 = vld [vmem:[%s4323_s3 + $0xce0] sm:$0xff]  ;;  %v889_v35 = vld [vmem:[%s4323_s3 + $0xe78] sm:$0xff] }
  0xe7   :  { %1379 = vmatpush.msrb.mxu1 %v736_v36  ;;  %1396 = vmatpush.msrb.mxu2 %v793_v37  ;;  %v937_v36 = vld [vmem:[%s4323_s3 + $0xff8] sm:$0xff]  ;;  %v982_v37 = vld [vmem:[%s4323_s3 + $0x1160] sm:$0xff] }
  0xe8   :  { %1341 = vmatpush.msrb.mxu3 %v634_v38  ;;  %1360 = vmatpush.msrb.mxu0 %v685_v39  ;;  %v835_v38 = vld [vmem:[%s4323_s3 + $0xcc8] sm:$0xff]  ;;  %v886_v39 = vld [vmem:[%s4323_s3 + $0xe60] sm:$0xff] }
  0xe9   :  { %1380 = vmatpush.msrb.mxu1 %v733_v41  ;;  %1397 = vmatpush.msrb.mxu2 %v790_v42  ;;  %v934_v41 = vld [vmem:[%s4323_s3 + $0xfe0] sm:$0xff]  ;;  %v979_v42 = vld [vmem:[%s4323_s3 + $0x1148] sm:$0xff] }
  0xea   :  { %1342 = vmatpush.msrb.mxu3 %v631_v43  ;;  %1361 = vmatpush.msrb.mxu0 %v682_v44  ;;  %v832_v43 = vld [vmem:[%s4323_s3 + $0xcb0] sm:$0xff]  ;;  %v883_v44 = vld [vmem:[%s4323_s3 + $0xe48] sm:$0xff] }
  0xeb   :  { %1381 = vmatpush.msrb.mxu1 %v730_v45  ;;  %1398 = vmatpush.msrb.mxu2 %v787_v46  ;;  %v931_v45 = vld [vmem:[%s4323_s3 + $0xfc8] sm:$0xff]  ;;  %v976_v46 = vld [vmem:[%s4323_s3 + $0x1130] sm:$0xff] }
  0xec   :  { %1343 = vmatpush.msrb.mxu3 %v628_v47  ;;  %1362 = vmatpush.msrb.mxu0 %v679_v48  ;;  %v829_v47 = vld [vmem:[%s4323_s3 + $0xc98] sm:$0xff]  ;;  %v880_v48 = vld [vmem:[%s4323_s3 + $0xe30] sm:$0xff] }
  0xed   :  { %1382 = vmatpush.msrb.mxu1 %v727_v49  ;;  %1399 = vmatpush.msrb.mxu2 %v784_v51  ;;  %v928_v49 = vld [vmem:[%s4323_s3 + $0xfb0] sm:$0xff]  ;;  %v973_v51 = vld [vmem:[%s4323_s3 + $0x1118] sm:$0xff] }
  0xee   :  { %1344 = vmatpush.msrb.mxu3 %v625_v52  ;;  %1363 = vmatpush.msrb.mxu0 %v676_v54  ;;  %v826_v52 = vld [vmem:[%s4323_s3 + $0xc80] sm:$0xff]  ;;  %v877_v54 = vld [vmem:[%s4323_s3 + $0xe18] sm:$0xff] }
  0xef   :  { %1383 = vmatpush.msrb.mxu1 %v724_v58  ;;  %1400 = vmatpush.msrb.mxu2 %v781_v59  ;;  %v925_v58 = vld [vmem:[%s4323_s3 + $0xf98] sm:$0xff]  ;;  %v970_v59 = vld [vmem:[%s4323_s3 + $0x1100] sm:$0xff] }
  0xf0   :  { %1345 = vmatpush.msrb.mxu3 %v622_v60  ;;  %1364 = vmatpush.msrb.mxu0 %v673_v62  ;;  %v823_v60 = vld [vmem:[%s4323_s3 + $0xc68] sm:$0xff]  ;;  %v874_v62 = vld [vmem:[%s4323_s3 + $0xe00] sm:$0xff] }
  0xf1   :  { %1384 = vmatpush.msrb.mxu1 %v721_v63  ;;  %1401 = vmatpush.msrb.mxu2 %v778_v0  ;;  %v922_v63 = vld [vmem:[%s4323_s3 + $0xf80] sm:$0xff]  ;;  %v967_v0 = vld [vmem:[%s4323_s3 + $0x10e8] sm:$0xff] }
  0xf2   :  { %1346 = vmatpush.msrb.mxu3 %v619_v1  ;;  %1365 = vmatpush.msrb.mxu0 %v670_v2  ;;  %v820_v1 = vld [vmem:[%s4323_s3 + $0xc50] sm:$0xff]  ;;  %v871_v2 = vld [vmem:[%s4323_s3 + $0xde8] sm:$0xff] }
  0xf3   :  { %1385 = vmatpush.msrb.mxu1 %v718_v3  ;;  %1402 = vmatpush.msrb.mxu2 %v775_v6  ;;  %v919_v3 = vld [vmem:[%s4323_s3 + $0xf68] sm:$0xff]  ;;  %v964_v6 = vld [vmem:[%s4323_s3 + $0x10d0] sm:$0xff] }
  0xf4   :  { %1347 = vmatmul.f32.vlgmr.msrb.gmra.mxu3 %v2807_v50  ;;  %1366 = vmatpush.msrb.mxu0 %v667_v7  ;;  %v817_v7 = vld [vmem:[%s4323_s3 + $0xc38] sm:$0xff] }
  0xf5   :  { %1411 = vmatpush.msra.mxu3 %v856_v8  ;;  %1386 = vmatpush.msrb.mxu1 %v715_v9  ;;  %v868_v8 = vld [vmem:[%s4323_s3 + $0xdd0] sm:$0xff] }
  0xf6   :  { %1403 = vmatpush.msrb.mxu2 %v772_v10  ;;  %1367 = vmatmul.f32.vlgmr.msrb.gmra.mxu0 %v2825_v57  ;;  %v916_v9 = vld [vmem:[%s4323_s3 + $0xf50] sm:$0xff]  ;;  %v961_v10 = vld [vmem:[%s4323_s3 + $0x10b8] sm:$0xff] }
  0xf7   :  { %1387 = vmatmul.f32.vlgmr.msrb.gmra.mxu1 %v2815_v53  ;;  %1412 = vmatpush.msra.mxu3 %v853_v11  ;;  %v814_v11 = vld [vmem:[%s4323_s3 + $0xc20] sm:$0xff] }
  0xf8   :  { %1431 = vmatpush.msra.mxu0 %v904_v12  ;;  %1451 = vmatpush.msra.mxu1 %v952_v13  ;;  %v865_v12 = vld [vmem:[%s4323_s3 + $0xdb8] sm:$0xff] }
  0xf9   :  { %1404 = vmatpush.msrb.mxu2 %v769_v14  ;;  %1413 = vmatpush.msra.mxu3 %v850_v15  ;;  %v913_v13 = vld [vmem:[%s4323_s3 + $0xf38] sm:$0xff]  ;;  %v958_v14 = vld [vmem:[%s4323_s3 + $0x10a0] sm:$0xff]  ;;  %v811_v15 = vld [vmem:[%s4323_s3 + $0xc08] sm:$0xff] }
  0xfa   :  { %1432 = vmatpush.msra.mxu0 %v901_v16  ;;  %1452 = vmatpush.msra.mxu1 %v949_v17  ;;  %v862_v16 = vld [vmem:[%s4323_s3 + $0xda0] sm:$0xff] }
  0xfb   :  { %1405 = vmatpush.msrb.mxu2 %v766_v20  ;;  %1414 = vmatpush.msra.mxu3 %v847_v21  ;;  %v910_v17 = vld [vmem:[%s4323_s3 + $0xf20] sm:$0xff]  ;;  %v955_v20 = vld [vmem:[%s4323_s3 + $0x1088] sm:$0xff]  ;;  %v473_v21 = vld [vmem:[%s4323_s3 + $0x178] sm:$0xff] }
  0xfc   :  { %1433 = vmatpush.msra.mxu0 %v898_v22  ;;  %1453 = vmatpush.msra.mxu1 %v946_v23  ;;  %v521_v22 = vld [vmem:[%s4323_s3 + $0x2f8] sm:$0xff]  ;;  %v859_v23 = vld [vmem:[%s4323_s3 + $0xd88] sm:$0xff] }
  0xfd   :  { %1406 = vmatpush.msrb.mxu2 %v763_v24  ;;  %1415 = vmatpush.msra.mxu3 %v844_v25  ;;  %v907_v24 = vld [vmem:[%s4323_s3 + $0xf08] sm:$0xff]  ;;  %v470_v25 = vld [vmem:[%s4323_s3 + $0x160] sm:$0xff] }
  0xfe   :  { %1407 = vmatmul.f32.vlgmr.msrb.gmra.mxu2 %v2823_v56  ;;  %1434 = vmatpush.msra.mxu0 %v895_v26  ;;  %v518_v26 = vld [vmem:[%s4323_s3 + $0x2e0] sm:$0xff] }
  0xff   :  { %1454 = vmatpush.msra.mxu1 %v943_v27  ;;  %2013 = vmatpush.msk.msra.mxu2 %vm137_vm0, %v988_v28  ;;  %v569_v27 = vld [vmem:[%s4323_s3 + $0x478] sm:$0xff] }
 0x100   :  { %1416 = vmatpush.msra.mxu3 %v841_v29  ;;  %1435 = vmatpush.msra.mxu0 %v892_v30  ;;  %v617_v28 = vld [vmem:[%s4323_s3 + $0x5f8] sm:$0xff]  ;;  %v467_v29 = vld [vmem:[%s4323_s3 + $0x148] sm:$0xff] }
 0x101   :  { %1455 = vmatpush.msra.mxu1 %v940_v31  ;;  %1476 = vmatpush.msra.mxu2 %v985_v32  ;;  %v515_v30 = vld [vmem:[%s4323_s3 + $0x2c8] sm:$0xff]  ;;  %v566_v31 = vld [vmem:[%s4323_s3 + $0x460] sm:$0xff] }
 0x102   :  { %1417 = vmatpush.msra.mxu3 %v838_v33  ;;  %1436 = vmatpush.msra.mxu0 %v889_v35  ;;  %v614_v32 = vld [vmem:[%s4323_s3 + $0x5e0] sm:$0xff]  ;;  %v464_v33 = vld [vmem:[%s4323_s3 + $0x130] sm:$0xff] }
 0x103   :  { %1456 = vmatpush.msra.mxu1 %v937_v36  ;;  %1477 = vmatpush.msra.mxu2 %v982_v37  ;;  %v512_v35 = vld [vmem:[%s4323_s3 + $0x2b0] sm:$0xff]  ;;  %v563_v36 = vld [vmem:[%s4323_s3 + $0x448] sm:$0xff] }
 0x104   :  { %1418 = vmatpush.msra.mxu3 %v835_v38  ;;  %1437 = vmatpush.msra.mxu0 %v886_v39  ;;  %v611_v37 = vld [vmem:[%s4323_s3 + $0x5c8] sm:$0xff]  ;;  %v461_v38 = vld [vmem:[%s4323_s3 + $0x118] sm:$0xff] }
 0x105   :  { %1457 = vmatpush.msra.mxu1 %v934_v41  ;;  %1478 = vmatpush.msra.mxu2 %v979_v42  ;;  %v509_v39 = vld [vmem:[%s4323_s3 + $0x298] sm:$0xff]  ;;  %v560_v41 = vld [vmem:[%s4323_s3 + $0x430] sm:$0xff] }
 0x106   :  { %1419 = vmatpush.msra.mxu3 %v832_v43  ;;  %1438 = vmatpush.msra.mxu0 %v883_v44  ;;  %v608_v42 = vld [vmem:[%s4323_s3 + $0x5b0] sm:$0xff]  ;;  %v458_v43 = vld [vmem:[%s4323_s3 + $0x100] sm:$0xff] }
 0x107   :  { %1458 = vmatpush.msra.mxu1 %v931_v45  ;;  %1479 = vmatpush.msra.mxu2 %v976_v46  ;;  %v506_v44 = vld [vmem:[%s4323_s3 + $0x280] sm:$0xff]  ;;  %v557_v45 = vld [vmem:[%s4323_s3 + $0x418] sm:$0xff] }
 0x108   :  { %1420 = vmatpush.msra.mxu3 %v829_v47  ;;  %1439 = vmatpush.msra.mxu0 %v880_v48  ;;  %v605_v46 = vld [vmem:[%s4323_s3 + $0x598] sm:$0xff]  ;;  %v455_v47 = vld [vmem:[%s4323_s3 + $0xe8] sm:$0xff] }
 0x109   :  { %1459 = vmatpush.msra.mxu1 %v928_v49  ;;  %1480 = vmatpush.msra.mxu2 %v973_v51  ;;  %v503_v48 = vld [vmem:[%s4323_s3 + $0x268] sm:$0xff]  ;;  %v554_v49 = vld [vmem:[%s4323_s3 + $0x400] sm:$0xff] }
 0x10a   :  { %1421 = vmatpush.msra.mxu3 %v826_v52  ;;  %1440 = vmatpush.msra.mxu0 %v877_v54  ;;  %v602_v51 = vld [vmem:[%s4323_s3 + $0x580] sm:$0xff]  ;;  %v452_v52 = vld [vmem:[%s4323_s3 + $0xd0] sm:$0xff] }
 0x10b   :  { %1460 = vmatpush.msra.mxu1 %v925_v58  ;;  %1481 = vmatpush.msra.mxu2 %v970_v59  ;;  %v500_v54 = vld [vmem:[%s4323_s3 + $0x250] sm:$0xff]  ;;  %v551_v58 = vld [vmem:[%s4323_s3 + $0x3e8] sm:$0xff] }
 0x10c   :  { %1422 = vmatpush.msra.mxu3 %v823_v60  ;;  %1441 = vmatpush.msra.mxu0 %v874_v62  ;;  %v599_v59 = vld [vmem:[%s4323_s3 + $0x568] sm:$0xff]  ;;  %v449_v60 = vld [vmem:[%s4323_s3 + $0xb8] sm:$0xff] }
 0x10d   :  { %1461 = vmatpush.msra.mxu1 %v922_v63  ;;  %1482 = vmatpush.msra.mxu2 %v967_v0  ;;  %v497_v62 = vld [vmem:[%s4323_s3 + $0x238] sm:$0xff]  ;;  %v548_v63 = vld [vmem:[%s4323_s3 + $0x3d0] sm:$0xff] }
 0x10e   :  { %1423 = vmatpush.msra.mxu3 %v820_v1  ;;  %1442 = vmatpush.msra.mxu0 %v871_v2  ;;  %v596_v0 = vld [vmem:[%s4323_s3 + $0x550] sm:$0xff]  ;;  %v446_v1 = vld [vmem:[%s4323_s3 + $0xa0] sm:$0xff] }
 0x10f   :  { %1462 = vmatpush.msra.mxu1 %v919_v3  ;;  %1483 = vmatpush.msra.mxu2 %v964_v6  ;;  %v494_v2 = vld [vmem:[%s4323_s3 + $0x220] sm:$0xff]  ;;  %v545_v3 = vld [vmem:[%s4323_s3 + $0x3b8] sm:$0xff] }
 0x110   :  { %1424 = vmatpush.msra.mxu3 %v817_v7  ;;  %1443 = vmatpush.msra.mxu0 %v868_v8  ;;  %v593_v6 = vld [vmem:[%s4323_s3 + $0x538] sm:$0xff]  ;;  %v443_v7 = vld [vmem:[%s4323_s3 + $0x88] sm:$0xff] }
 0x111   :  { %1463 = vmatpush.msra.mxu1 %v916_v9  ;;  %1484 = vmatpush.msra.mxu2 %v961_v10  ;;  %v491_v8 = vld [vmem:[%s4323_s3 + $0x208] sm:$0xff]  ;;  %v542_v9 = vld [vmem:[%s4323_s3 + $0x3a0] sm:$0xff] }
 0x112   :  { %1425 = vmatpush.msra.mxu3 %v814_v11  ;;  %1444 = vmatpush.msra.mxu0 %v865_v12  ;;  %v590_v10 = vld [vmem:[%s4323_s3 + $0x520] sm:$0xff]  ;;  %v440_v11 = vld [vmem:[%s4323_s3 + $0x70] sm:$0xff] }
 0x113   :  { %1464 = vmatpush.msra.mxu1 %v913_v13  ;;  %1485 = vmatpush.msra.mxu2 %v958_v14  ;;  %v488_v12 = vld [vmem:[%s4323_s3 + $0x1f0] sm:$0xff]  ;;  %v539_v13 = vld [vmem:[%s4323_s3 + $0x388] sm:$0xff] }
 0x114   :  { %1426 = vmatpush.msra.mxu3 %v811_v15  ;;  %1445 = vmatpush.msra.mxu0 %v862_v16  ;;  %v587_v14 = vld [vmem:[%s4323_s3 + $0x508] sm:$0xff]  ;;  %v437_v15 = vld [vmem:[%s4323_s3 + $0x58] sm:$0xff] }
 0x115   :  { %1465 = vmatpush.msra.mxu1 %v910_v17  ;;  %1486 = vmatpush.msra.mxu2 %v955_v20  ;;  %v485_v16 = vld [vmem:[%s4323_s3 + $0x1d8] sm:$0xff]  ;;  %v536_v17 = vld [vmem:[%s4323_s3 + $0x370] sm:$0xff] }
 0x116   :  { %1427 = vmatmul.f32.vlgmr.msra.gmra.mxu3 %v2923_v34  ;;  %2014 = vmatmul.msk.f32.vlgmr.msra.gmra.mxu2 %vm998_vm2, %v2977_v61  ;;  %v584_v20 = vld [vmem:[%s4323_s3 + $0x4f0] sm:$0xff] }
 0x117   :  { %1491 = vmatpush.msrb.mxu2 %v473_v21  ;;  %1511 = vmatpush.msrb.mxu3 %v521_v22  ;;  %v434_v21 = vld [vmem:[%s4323_s3 + $0x40] sm:$0xff] }
 0x118   :  { %1446 = vmatpush.msra.mxu0 %v859_v23  ;;  %1466 = vmatpush.msra.mxu1 %v907_v24  ;;  %v482_v22 = vld [vmem:[%s4323_s3 + $0x1c0] sm:$0xff]  ;;  %v533_v23 = vld [vmem:[%s4323_s3 + $0x358] sm:$0xff] }
 0x119   :  { %1447 = vmatmul.f32.vlgmr.msra.gmra.mxu0 %v2935_v40  ;;  %1467 = vmatmul.f32.vlgmr.msra.gmra.mxu1 %v2966_v55  ;;  %v581_v24 = vld [vmem:[%s4323_s3 + $0x4d8] sm:$0xff] }
 0x11a   :  { %1492 = vmatpush.msrb.mxu2 %v470_v25  ;;  %1512 = vmatpush.msrb.mxu3 %v518_v26  ;;  %v431_v25 = vld [vmem:[%s4323_s3 + $0x28] sm:$0xff] }
 0x11b   :  { %1531 = vmatpush.msrb.mxu0 %v569_v27  ;;  %1551 = vmatpush.msrb.mxu1 %v617_v28  ;;  %v479_v26 = vld [vmem:[%s4323_s3 + $0x1a8] sm:$0xff]  ;;  %v530_v27 = vld [vmem:[%s4323_s3 + $0x340] sm:$0xff] }
 0x11c   :  { %1493 = vmatpush.msrb.mxu2 %v467_v29  ;;  %1513 = vmatpush.msrb.mxu3 %v515_v30  ;;  %v578_v28 = vld [vmem:[%s4323_s3 + $0x4c0] sm:$0xff]  ;;  %v428_v29 = vld [vmem:[%s4323_s3 + $0x10] sm:$0xff] }
 0x11d   :  { %1532 = vmatpush.msrb.mxu0 %v566_v31  ;;  %1552 = vmatpush.msrb.mxu1 %v614_v32  ;;  %v476_v30 = vld [vmem:[%s4323_s3 + $0x190] sm:$0xff]  ;;  %v527_v31 = vld [vmem:[%s4323_s3 + $0x328] sm:$0xff] }
 0x11e   :  { %1494 = vmatpush.msrb.mxu2 %v464_v33  ;;  %1514 = vmatpush.msrb.mxu3 %v512_v35  ;;  %v575_v32 = vld [vmem:[%s4323_s3 + $0x4a8] sm:$0xff]  ;;  %v665_v33 = vld [vmem:[%s4323_s3 + $0x778] sm:$0xff] }
 0x11f   :  { %1533 = vmatpush.msrb.mxu0 %v563_v36  ;;  %1553 = vmatpush.msrb.mxu1 %v611_v37  ;;  %v713_v35 = vld [vmem:[%s4323_s3 + $0x8f8] sm:$0xff]  ;;  %v524_v36 = vld [vmem:[%s4323_s3 + $0x310] sm:$0xff] }
 0x120   :  { %1495 = vmatpush.msrb.mxu2 %v461_v38  ;;  %1515 = vmatpush.msrb.mxu3 %v509_v39  ;;  %v572_v37 = vld [vmem:[%s4323_s3 + $0x490] sm:$0xff]  ;;  %v662_v38 = vld [vmem:[%s4323_s3 + $0x760] sm:$0xff] }
 0x121   :  { %1534 = vmatpush.msrb.mxu0 %v560_v41  ;;  %1554 = vmatpush.msrb.mxu1 %v608_v42  ;;  %v710_v39 = vld [vmem:[%s4323_s3 + $0x8e0] sm:$0xff]  ;;  %v761_v41 = vld [vmem:[%s4323_s3 + $0xa78] sm:$0xff]  ;;  %v707_v42 = vld [vmem:[%s4323_s3 + $0x8c8] sm:$0xff] }
 0x122   :  { %1496 = vmatpush.msrb.mxu2 %v458_v43  ;;  %1516 = vmatpush.msrb.mxu3 %v506_v44  ;;  %v758_v43 = vld [vmem:[%s4323_s3 + $0xa60] sm:$0xff]  ;;  %v704_v44 = vld [vmem:[%s4323_s3 + $0x8b0] sm:$0xff] }
 0x123   :  { %1535 = vmatpush.msrb.mxu0 %v557_v45  ;;  %1555 = vmatpush.msrb.mxu1 %v605_v46  ;;  %v755_v45 = vld [vmem:[%s4323_s3 + $0xa48] sm:$0xff] }
 0x124   :  { %1497 = vmatpush.msrb.mxu2 %v455_v47  ;;  %1517 = vmatpush.msrb.mxu3 %v503_v48  ;;  %v803_v46 = vld [vmem:[%s4323_s3 + $0xbc8] sm:$0xff]  ;;  %v653_v47 = vld [vmem:[%s4323_s3 + $0x718] sm:$0xff] }
 0x125   :  { %1536 = vmatpush.msrb.mxu0 %v554_v49  ;;  %1556 = vmatpush.msrb.mxu1 %v602_v51  ;;  %v701_v48 = vld [vmem:[%s4323_s3 + $0x898] sm:$0xff]  ;;  %v752_v49 = vld [vmem:[%s4323_s3 + $0xa30] sm:$0xff] }
 0x126   :  { %1498 = vmatpush.msrb.mxu2 %v452_v52  ;;  %1518 = vmatpush.msrb.mxu3 %v500_v54  ;;  %v800_v51 = vld [vmem:[%s4323_s3 + $0xbb0] sm:$0xff]  ;;  %v650_v52 = vld [vmem:[%s4323_s3 + $0x700] sm:$0xff] }
 0x127   :  { %1537 = vmatpush.msrb.mxu0 %v551_v58  ;;  %1557 = vmatpush.msrb.mxu1 %v599_v59  ;;  %v698_v54 = vld [vmem:[%s4323_s3 + $0x880] sm:$0xff]  ;;  %v749_v58 = vld [vmem:[%s4323_s3 + $0xa18] sm:$0xff] }
 0x128   :  { %1499 = vmatpush.msrb.mxu2 %v449_v60  ;;  %1519 = vmatpush.msrb.mxu3 %v497_v62  ;;  %v797_v59 = vld [vmem:[%s4323_s3 + $0xb98] sm:$0xff]  ;;  %v647_v60 = vld [vmem:[%s4323_s3 + $0x6e8] sm:$0xff] }
 0x129   :  { %1538 = vmatpush.msrb.mxu0 %v548_v63  ;;  %1558 = vmatpush.msrb.mxu1 %v596_v0  ;;  %v695_v62 = vld [vmem:[%s4323_s3 + $0x868] sm:$0xff]  ;;  %v746_v63 = vld [vmem:[%s4323_s3 + $0xa00] sm:$0xff] }
 0x12a   :  { %1500 = vmatpush.msrb.mxu2 %v446_v1  ;;  %1520 = vmatpush.msrb.mxu3 %v494_v2  ;;  %v794_v0 = vld [vmem:[%s4323_s3 + $0xb80] sm:$0xff]  ;;  %v644_v1 = vld [vmem:[%s4323_s3 + $0x6d0] sm:$0xff] }
 0x12b   :  { %1539 = vmatpush.msrb.mxu0 %v545_v3  ;;  %1559 = vmatpush.msrb.mxu1 %v593_v6  ;;  %v692_v2 = vld [vmem:[%s4323_s3 + $0x850] sm:$0xff]  ;;  %v743_v3 = vld [vmem:[%s4323_s3 + $0x9e8] sm:$0xff] }
 0x12c   :  { %1501 = vmatpush.msrb.mxu2 %v443_v7  ;;  %1521 = vmatpush.msrb.mxu3 %v491_v8  ;;  %v791_v6 = vld [vmem:[%s4323_s3 + $0xb68] sm:$0xff]  ;;  %v641_v7 = vld [vmem:[%s4323_s3 + $0x6b8] sm:$0xff] }
 0x12d   :  { %1540 = vmatpush.msrb.mxu0 %v542_v9  ;;  %1560 = vmatpush.msrb.mxu1 %v590_v10  ;;  %v689_v8 = vld [vmem:[%s4323_s3 + $0x838] sm:$0xff]  ;;  %v740_v9 = vld [vmem:[%s4323_s3 + $0x9d0] sm:$0xff] }
 0x12e   :  { %1502 = vmatpush.msrb.mxu2 %v440_v11  ;;  %1522 = vmatpush.msrb.mxu3 %v488_v12  ;;  %v788_v10 = vld [vmem:[%s4323_s3 + $0xb50] sm:$0xff]  ;;  %v638_v11 = vld [vmem:[%s4323_s3 + $0x6a0] sm:$0xff] }
 0x12f   :  { %1541 = vmatpush.msrb.mxu0 %v539_v13  ;;  %1561 = vmatpush.msrb.mxu1 %v587_v14  ;;  %v686_v12 = vld [vmem:[%s4323_s3 + $0x820] sm:$0xff]  ;;  %v737_v13 = vld [vmem:[%s4323_s3 + $0x9b8] sm:$0xff] }
 0x130   :  { %1503 = vmatpush.msrb.mxu2 %v437_v15  ;;  %1523 = vmatpush.msrb.mxu3 %v485_v16  ;;  %v785_v14 = vld [vmem:[%s4323_s3 + $0xb38] sm:$0xff]  ;;  %v635_v15 = vld [vmem:[%s4323_s3 + $0x688] sm:$0xff] }
 0x131   :  { %1542 = vmatpush.msrb.mxu0 %v536_v17  ;;  %1562 = vmatpush.msrb.mxu1 %v584_v20  ;;  %v683_v16 = vld [vmem:[%s4323_s3 + $0x808] sm:$0xff]  ;;  %v734_v17 = vld [vmem:[%s4323_s3 + $0x9a0] sm:$0xff] }
 0x132   :  { %1504 = vmatpush.msrb.mxu2 %v434_v21  ;;  %1524 = vmatpush.msrb.mxu3 %v482_v22  ;;  %v782_v20 = vld [vmem:[%s4323_s3 + $0xb20] sm:$0xff]  ;;  %v632_v21 = vld [vmem:[%s4323_s3 + $0x670] sm:$0xff] }
 0x133   :  { %1543 = vmatpush.msrb.mxu0 %v533_v23  ;;  %1563 = vmatpush.msrb.mxu1 %v581_v24  ;;  %v680_v22 = vld [vmem:[%s4323_s3 + $0x7f0] sm:$0xff]  ;;  %v731_v23 = vld [vmem:[%s4323_s3 + $0x988] sm:$0xff] }
 0x134   :  { %1505 = vmatpush.msrb.mxu2 %v431_v25  ;;  %1525 = vmatpush.msrb.mxu3 %v479_v26  ;;  %v779_v24 = vld [vmem:[%s4323_s3 + $0xb08] sm:$0xff]  ;;  %v629_v25 = vld [vmem:[%s4323_s3 + $0x658] sm:$0xff] }
 0x135   :  { %1544 = vmatpush.msrb.mxu0 %v530_v27  ;;  %1564 = vmatpush.msrb.mxu1 %v578_v28  ;;  %v677_v26 = vld [vmem:[%s4323_s3 + $0x7d8] sm:$0xff]  ;;  %v728_v27 = vld [vmem:[%s4323_s3 + $0x970] sm:$0xff] }
 0x136   :  { %1506 = vmatpush.msrb.mxu2 %v428_v29  ;;  %1526 = vmatpush.msrb.mxu3 %v476_v30  ;;  %v776_v28 = vld [vmem:[%s4323_s3 + $0xaf0] sm:$0xff]  ;;  %v626_v29 = vld [vmem:[%s4323_s3 + $0x640] sm:$0xff] }
 0x137   :  { %1545 = vmatpush.msrb.mxu0 %v527_v31  ;;  %1565 = vmatpush.msrb.mxu1 %v575_v32  ;;  %v674_v30 = vld [vmem:[%s4323_s3 + $0x7c0] sm:$0xff]  ;;  %v725_v31 = vld [vmem:[%s4323_s3 + $0x958] sm:$0xff] }
 0x138   :  { %1507 = vmatmul.f32.vlgmr.msrb.gmra.mxu2 %v2716_v4  ;;  %1527 = vmatmul.f32.vlgmr.msrb.gmra.mxu3 %v2718_v5  ;;  %v809_v4 = vld [vmem:[%s4323_s3 + $0xbf8] sm:$0xff]  ;;  %v659_v5 = vld [vmem:[%s4323_s3 + $0x748] sm:$0xff] }
 0x139   :  { %1571 = vmatpush.msra.mxu2 %v665_v33  ;;  %1591 = vmatpush.msra.mxu3 %v713_v35  ;;  %v773_v32 = vld [vmem:[%s4323_s3 + $0xad8] sm:$0xff]  ;;  %v623_v33 = vld [vmem:[%s4323_s3 + $0x628] sm:$0xff] }
 0x13a   :  { %1546 = vmatpush.msrb.mxu0 %v524_v36  ;;  %1566 = vmatpush.msrb.mxu1 %v572_v37  ;;  %v671_v35 = vld [vmem:[%s4323_s3 + $0x7a8] sm:$0xff]  ;;  %v722_v36 = vld [vmem:[%s4323_s3 + $0x940] sm:$0xff] }
 0x13b   :  { %1547 = vmatmul.f32.vlgmr.msrb.gmra.mxu0 %v2742_v18  ;;  %1567 = vmatmul.f32.vlgmr.msrb.gmra.mxu1 %v2744_v19  ;;  %v806_v18 = vld [vmem:[%s4323_s3 + $0xbe0] sm:$0xff]  ;;  %v656_v19 = vld [vmem:[%s4323_s3 + $0x730] sm:$0xff] }
 0x13c   :  { %1572 = vmatpush.msra.mxu2 %v662_v38  ;;  %1592 = vmatpush.msra.mxu3 %v710_v39  ;;  %v770_v37 = vld [vmem:[%s4323_s3 + $0xac0] sm:$0xff]  ;;  %v620_v38 = vld [vmem:[%s4323_s3 + $0x610] sm:$0xff] }
 0x13d   :  { %1611 = vmatpush.msra.mxu0 %v761_v41  ;;  %1631 = vmatpush.msra.mxu1 %v809_v4  ;;  %v668_v39 = vld [vmem:[%s4323_s3 + $0x790] sm:$0xff]  ;;  %v719_v41 = vld [vmem:[%s4323_s3 + $0x928] sm:$0xff] }
 0x13e   :  { %1573 = vmatpush.msra.mxu2 %v659_v5  ;;  %1593 = vmatpush.msra.mxu3 %v707_v42  ;;  %v767_v4 = vld [vmem:[%s4323_s3 + $0xaa8] sm:$0xff]  ;;  %v857_v5 = vld [vmem:[%s4323_s3 + $0xd78] sm:$0xff] }
 0x13f   :  { %1612 = vmatpush.msra.mxu0 %v758_v43  ;;  %1632 = vmatpush.msra.mxu1 %v806_v18  ;;  %v905_v42 = vld [vmem:[%s4323_s3 + $0xef8] sm:$0xff]  ;;  %v716_v43 = vld [vmem:[%s4323_s3 + $0x910] sm:$0xff] }
 0x140   :  { %1574 = vmatpush.msra.mxu2 %v656_v19  ;;  %1594 = vmatpush.msra.mxu3 %v704_v44  ;;  %v764_v18 = vld [vmem:[%s4323_s3 + $0xa90] sm:$0xff]  ;;  %v854_v19 = vld [vmem:[%s4323_s3 + $0xd60] sm:$0xff] }
 0x141   :  { %1613 = vmatpush.msra.mxu0 %v755_v45  ;;  %1633 = vmatpush.msra.mxu1 %v803_v46  ;;  %v902_v44 = vld [vmem:[%s4323_s3 + $0xee0] sm:$0xff]  ;;  %v953_v45 = vld [vmem:[%s4323_s3 + $0x1078] sm:$0xff]  ;;  %v899_v46 = vld [vmem:[%s4323_s3 + $0xec8] sm:$0xff] }
 0x142   :  { %1575 = vmatpush.msra.mxu2 %v653_v47  ;;  %1595 = vmatpush.msra.mxu3 %v701_v48  ;;  %v950_v47 = vld [vmem:[%s4323_s3 + $0x1060] sm:$0xff]  ;;  %v896_v48 = vld [vmem:[%s4323_s3 + $0xeb0] sm:$0xff] }
 0x143   :  { %1614 = vmatpush.msra.mxu0 %v752_v49  ;;  %1634 = vmatpush.msra.mxu1 %v800_v51  ;;  %v947_v49 = vld [vmem:[%s4323_s3 + $0x1048] sm:$0xff] }
 0x144   :  { %1576 = vmatpush.msra.mxu2 %v650_v52  ;;  %1596 = vmatpush.msra.mxu3 %v698_v54  ;;  %v983_v51 = vld [vmem:[%s4323_s3 + $0x1168] sm:$0xff]  ;;  %v3965_v52 = vld [vmem:[%s4325_s4] sm:$0x7]  ;;  %v845_v54 = vld [vmem:[%s4323_s3 + $0xd18] sm:$0xff] }
 0x145   :  { %1615 = vmatpush.msra.mxu0 %v749_v58  ;;  %1635 = vmatpush.msra.mxu1 %v797_v59  ;;  %v893_v58 = vld [vmem:[%s4323_s3 + $0xe98] sm:$0xff]  ;;  %v944_v59 = vld [vmem:[%s4323_s3 + $0x1030] sm:$0xff] }
 0x146   :  { %1577 = vmatpush.msra.mxu2 %v647_v60  ;;  %1597 = vmatpush.msra.mxu3 %v695_v62  ;;  %v980_v60 = vld [vmem:[%s4323_s3 + $0x1150] sm:$0xff]  ;;  %v842_v62 = vld [vmem:[%s4323_s3 + $0xd00] sm:$0xff] }
 0x147   :  { %1616 = vmatpush.msra.mxu0 %v746_v63  ;;  %1636 = vmatpush.msra.mxu1 %v794_v0  ;;  %v890_v63 = vld [vmem:[%s4323_s3 + $0xe80] sm:$0xff]  ;;  %v992_v0 = vperm.slane %v3965_v52, 0 }
 0x148   :  { %1578 = vmatpush.msra.mxu2 %v644_v1  ;;  %1598 = vmatpush.msra.mxu3 %v692_v2  ;;  %v941_v1 = vld [vmem:[%s4323_s3 + $0x1018] sm:$0xff] }
 0x149   :  { %1617 = vmatpush.msra.mxu0 %v743_v3  ;;  %1637 = vmatpush.msra.mxu1 %v791_v6  ;;  %v977_v2 = vld [vmem:[%s4323_s3 + $0x1138] sm:$0xff]  ;;  %v1028_v3 = vpop.f32.mrf.mxu0  ;;  %v3992_v6 = vpop.f32.mrf.mxu3 }
 0x14a   :  { %1579 = vmatpush.msra.mxu2 %v641_v7  ;;  %1599 = vmatpush.msra.mxu3 %v689_v8  ;;  %v839_v7 = vld [vmem:[%s4323_s3 + $0xce8] sm:$0xff] }
 0x14b   :  { %1618 = vmatpush.msra.mxu0 %v740_v9  ;;  %1638 = vmatpush.msra.mxu1 %v788_v10  ;;  %v887_v8 = vld [vmem:[%s4323_s3 + $0xe68] sm:$0xff]  ;;  %v938_v9 = vld [vmem:[%s4323_s3 + $0x1000] sm:$0xff] }
 0x14c   :  { %1580 = vmatpush.msra.mxu2 %v638_v11  ;;  %1600 = vmatpush.msra.mxu3 %v686_v12  ;;  %v974_v10 = vld [vmem:[%s4323_s3 + $0x1120] sm:$0xff]  ;;  %v836_v11 = vld [vmem:[%s4323_s3 + $0xcd0] sm:$0xff] }
 0x14d   :  { %1619 = vmatpush.msra.mxu0 %v737_v13  ;;  %1639 = vmatpush.msra.mxu1 %v785_v14  ;;  %v884_v12 = vld [vmem:[%s4323_s3 + $0xe50] sm:$0xff]  ;;  %v1029_v13 = vadd.f32 %v1028_v3, %v992_v0  ;;  %v935_v14 = vld [vmem:[%s4323_s3 + $0xfe8] sm:$0xff] }
 0x14e   :  { %1581 = vmatpush.msra.mxu2 %v635_v15  ;;  %1601 = vmatpush.msra.mxu3 %v683_v16  ;;  %v971_v15 = vld [vmem:[%s4323_s3 + $0x1108] sm:$0xff]  ;;  %v1048_v16 = vpop.f32.mrf.mxu1  ;;  %v1764_v3 = vld [vmem:[%s4326_s5 + $0xf0] sm:$0xff] }
 0x14f   :  { %1620 = vmatpush.msra.mxu0 %v734_v17  ;;  %1640 = vmatpush.msra.mxu1 %v782_v20  ;;  %v833_v17 = vld [vmem:[%s4323_s3 + $0xcb8] sm:$0xff] }
 0x150   :  { %1582 = vmatpush.msra.mxu2 %v632_v21  ;;  %1602 = vmatpush.msra.mxu3 %v680_v22  ;;  %v881_v20 = vld [vmem:[%s4323_s3 + $0xe38] sm:$0xff]  ;;  %v932_v21 = vld [vmem:[%s4323_s3 + $0xfd0] sm:$0xff] }
 0x151   :  { %1621 = vmatpush.msra.mxu0 %v731_v23  ;;  %1641 = vmatpush.msra.mxu1 %v779_v24  ;;  %v968_v22 = vld [vmem:[%s4323_s3 + $0x10f0] sm:$0xff]  ;;  %v830_v23 = vld [vmem:[%s4323_s3 + $0xca0] sm:$0xff] }
 0x152   :  { %1583 = vmatpush.msra.mxu2 %v629_v25  ;;  %1603 = vmatpush.msra.mxu3 %v677_v26  ;;  %v878_v24 = vld [vmem:[%s4323_s3 + $0xe20] sm:$0xff]  ;;  %v1049_v25 = vadd.f32 %v1048_v16, %v1029_v13  ;;  %v929_v26 = vld [vmem:[%s4323_s3 + $0xfb8] sm:$0xff] }
 0x153   :  { %1622 = vmatpush.msra.mxu0 %v728_v27  ;;  %1642 = vmatpush.msra.mxu1 %v776_v28  ;;  %v965_v27 = vld [vmem:[%s4323_s3 + $0x10d8] sm:$0xff]  ;;  %v1068_v28 = vpop.f32.mrf.mxu2 }
 0x154   :  { %1584 = vmatpush.msra.mxu2 %v626_v29  ;;  %1604 = vmatpush.msra.mxu3 %v674_v30  ;;  %v827_v29 = vld [vmem:[%s4323_s3 + $0xc88] sm:$0xff]  ;;  %v1741_v16 = vld [vmem:[%s4326_s5 + $0x38] sm:$0xff] }
 0x155   :  { %1623 = vmatpush.msra.mxu0 %v725_v31  ;;  %1643 = vmatpush.msra.mxu1 %v773_v32  ;;  %v875_v30 = vld [vmem:[%s4323_s3 + $0xe08] sm:$0xff]  ;;  %v926_v31 = vld [vmem:[%s4323_s3 + $0xfa0] sm:$0xff] }
 0x156   :  { %1585 = vmatpush.msra.mxu2 %v623_v33  ;;  %1605 = vmatpush.msra.mxu3 %v671_v35  ;;  %v962_v32 = vld [vmem:[%s4323_s3 + $0x10c0] sm:$0xff]  ;;  %v4054_v33 = vpop.f32.mrf.mxu3  ;;  %v824_v35 = vld [vmem:[%s4323_s3 + $0xc70] sm:$0xff] }
 0x157   :  { %1624 = vmatpush.msra.mxu0 %v722_v36  ;;  %1644 = vmatpush.msra.mxu1 %v770_v37  ;;  %v872_v36 = vld [vmem:[%s4323_s3 + $0xdf0] sm:$0xff]  ;;  %v1069_v37 = vadd.f32 %v1068_v28, %v1049_v25  ;;  %v1739_v25 = vld [vmem:[%s4326_s5 + $0x28] sm:$0xff]  ;;  %v1758_v28 = vld [vmem:[%s4326_s5 + $0xc0] sm:$0xff] }
 0x158   :  { %1586 = vmatpush.msra.mxu2 %v620_v38  ;;  %1606 = vmatpush.msra.mxu3 %v668_v39  ;;  %v923_v38 = vld [vmem:[%s4323_s3 + $0xf88] sm:$0xff] }
 0x159   :  { %1625 = vmatpush.msra.mxu0 %v719_v41  ;;  %1645 = vmatpush.msra.mxu1 %v767_v4  ;;  %v959_v39 = vld [vmem:[%s4323_s3 + $0x10a8] sm:$0xff]  ;;  %v821_v41 = vld [vmem:[%s4323_s3 + $0xc58] sm:$0xff] }
 0x15a   :  { %1587 = vmatmul.f32.vlgmr.msra.gmra.mxu2 %v2807_v50  ;;  %1607 = vmatmul.f32.vlgmr.msra.gmra.mxu3 %v2825_v57  ;;  %v989_v50 = vld [vmem:[%s4323_s3 + $0x1198] sm:$0xf]  ;;  %v851_v57 = vld [vmem:[%s4323_s3 + $0xd48] sm:$0xff] }
 0x15b   :  { %1651 = vmatpush.msrb.mxu2 %v857_v5  ;;  %1671 = vmatpush.msrb.mxu3 %v905_v42  ;;  %v869_v4 = vld [vmem:[%s4323_s3 + $0xdd8] sm:$0xff]  ;;  %v920_v5 = vld [vmem:[%s4323_s3 + $0xf70] sm:$0xff] }
 0x15c   :  { %1626 = vmatpush.msra.mxu0 %v716_v43  ;;  %1646 = vmatpush.msra.mxu1 %v764_v18  ;;  %v956_v42 = vld [vmem:[%s4323_s3 + $0x1090] sm:$0xff]  ;;  %v818_v43 = vld [vmem:[%s4323_s3 + $0xc40] sm:$0xff]  ;;  %v1089_v18 = vadd.f32 %v3992_v6, %v1069_v37  ;;  %v993_v6 = vperm.slane %v3965_v52, 1  ;;  %v1737_v37 = vld [vmem:[%s4326_s5 + $0x18] sm:$0xff] }
 0x15d   :  { %1627 = vmatmul.f32.vlgmr.msra.gmra.mxu0 %v2815_v53  ;;  %1647 = vmatmul.f32.vlgmr.msra.gmra.mxu1 %v2823_v56  ;;  %v986_v53 = vld [vmem:[%s4323_s3 + $0x1180] sm:$0xff]  ;;  %v848_v56 = vld [vmem:[%s4323_s3 + $0xd30] sm:$0xff] }
 0x15e   :  { %1652 = vmatpush.msrb.mxu2 %v854_v19  ;;  %1672 = vmatpush.msrb.mxu3 %v902_v44  ;;  %v1749_v19 = vld [vmem:[%s4326_s5 + $0x78] sm:$0xff]  ;;  %v866_v44 = vld [vmem:[%s4323_s3 + $0xdc0] sm:$0xff] }
 0x15f   :  { %1691 = vmatpush.msrb.mxu0 %v953_v45  ;;  %2015 = vmatpush.msk.msrb.mxu1 %vm137_vm0, %v989_v50  ;;  %v1108_v45 = vpop.f32.mrf.mxu0  ;;  %v917_v50 = vld [vmem:[%s4323_s3 + $0xf58] sm:$0xff] }
 0x160   :  { %1653 = vmatpush.msrb.mxu2 %v851_v57  ;;  %1673 = vmatpush.msrb.mxu3 %v899_v46  ;;  %v815_v57 = vld [vmem:[%s4323_s3 + $0xc28] sm:$0xff]  ;;  %v1748_v46 = vld [vmem:[%s4326_s5 + $0x70] sm:$0xff] }
 0x161   :  { %1692 = vmatpush.msrb.mxu0 %v950_v47  ;;  %1716 = vmatpush.msrb.mxu1 %v986_v53  ;;  %v863_v47 = vld [vmem:[%s4323_s3 + $0xda8] sm:$0xff]  ;;  %v4104_v53 = vpop.f32.mrf.mxu3 }
 0x162   :  { %1654 = vmatpush.msrb.mxu2 %v848_v56  ;;  %1674 = vmatpush.msrb.mxu3 %v896_v48  ;;  %v914_v56 = vld [vmem:[%s4323_s3 + $0xf40] sm:$0xff]  ;;  %v1109_v48 = vadd.f32 %v1108_v45, %v1089_v18  ;;  %v1753_v45 = vld [vmem:[%s4326_s5 + $0x98] sm:$0xff] }
 0x163   :  { %1693 = vmatpush.msrb.mxu0 %v947_v49  ;;  %1717 = vmatpush.msrb.mxu1 %v983_v51  ;;  %v1747_v49 = vld [vmem:[%s4326_s5 + $0x68] sm:$0xff]  ;;  %v860_v51 = vld [vmem:[%s4323_s3 + $0xd90] sm:$0xff]  ;;  %v1754_v18 = vld [vmem:[%s4326_s5 + $0xa0] sm:$0xff] }
 0x164   :  { %1655 = vmatpush.msrb.mxu2 %v845_v54  ;;  %1675 = vmatpush.msrb.mxu3 %v893_v58  ;;  %v1128_v54 = vpop.f32.mrf.mxu1  ;;  %v1148_v58 = vpop.f32.mrf.mxu2 }
 0x165   :  { %1694 = vmatpush.msrb.mxu0 %v944_v59  ;;  %1718 = vmatpush.msrb.mxu1 %v980_v60  ;;  %v911_v59 = vld [vmem:[%s4323_s3 + $0xf28] sm:$0xff]  ;;  %v1746_v60 = vld [vmem:[%s4326_s5 + $0x60] sm:$0xff]  ;;  %v1129_v0 = vadd.f32 %v1128_v54, %v1109_v48 }
 0x166   :  { %1656 = vmatpush.msrb.mxu2 %v842_v62  ;;  %1676 = vmatpush.msrb.mxu3 %v890_v63  ;;  %v908_v62 = vld [vmem:[%s4323_s3 + $0xf10] sm:$0xff]  ;;  %v1765_v63 = vld [vmem:[%s4326_s5 + $0xf8] sm:$0xff] }
 0x167   :  { %1695 = vmatpush.msrb.mxu0 %v941_v1  ;;  %1719 = vmatpush.msrb.mxu1 %v977_v2  ;;  %v1745_v1 = vld [vmem:[%s4326_s5 + $0x58] sm:$0xff]  ;;  %v1188_v2 = vpop.f32.mrf.mxu0 }
 0x168   :  { %1657 = vmatpush.msrb.mxu2 %v839_v7  ;;  %1677 = vmatpush.msrb.mxu3 %v887_v8  ;;  %v1744_v7 = vld [vmem:[%s4326_s5 + $0x50] sm:$0xff]  ;;  %v1149_v8 = vadd.f32 %v1148_v58, %v1129_v0 }
 0x169   :  { %1696 = vmatpush.msrb.mxu0 %v938_v9  ;;  %1720 = vmatpush.msrb.mxu1 %v974_v10  ;;  %v1743_v9 = vld [vmem:[%s4326_s5 + $0x48] sm:$0xff] }
 0x16a   :  { %1658 = vmatpush.msrb.mxu2 %v836_v11  ;;  %1678 = vmatpush.msrb.mxu3 %v884_v12  ;;  %v1762_v12 = vld [vmem:[%s4326_s5 + $0xe0] sm:$0xff] }
 0x16b   :  { %1697 = vmatpush.msrb.mxu0 %v935_v14  ;;  %1721 = vmatpush.msrb.mxu1 %v971_v15  ;;  %v1761_v14 = vld [vmem:[%s4326_s5 + $0xd8] sm:$0xff]  ;;  %v1169_v15 = vadd.f32 %v4054_v33, %v1149_v8  ;;  %v1767_v8 = vld [vmem:[%s4326_s5 + $0x108] sm:$0xff] }
 0x16c   :  { %1659 = vmatpush.msrb.mxu2 %v833_v17  ;;  %1679 = vmatpush.msrb.mxu3 %v881_v20  ;;  %v1208_v10 = vpop.f32.mrf.mxu1  ;;  %v1228_v11 = vpop.f32.mrf.mxu2  ;;  %v1760_v20 = vld [vmem:[%s4326_s5 + $0xd0] sm:$0xff]  ;;  %v1757_v33 = vld [vmem:[%s4326_s5 + $0xb8] sm:$0xff] }
 0x16d   :  { %1698 = vmatpush.msrb.mxu0 %v932_v21  ;;  %1722 = vmatpush.msrb.mxu1 %v968_v22  ;;  %v1189_v21 = vadd.f32 %v1188_v2, %v1169_v15  ;;  %v994_v2 = vperm.slane %v3965_v52, 2 }
 0x16e   :  { %1660 = vmatpush.msrb.mxu2 %v830_v23  ;;  %1680 = vmatpush.msrb.mxu3 %v878_v24  ;;  %v1740_v23 = vld [vmem:[%s4326_s5 + $0x30] sm:$0xff]  ;;  %v1759_v24 = vld [vmem:[%s4326_s5 + $0xc8] sm:$0xff] }
 0x16f   :  { %1699 = vmatpush.msrb.mxu0 %v929_v26  ;;  %1723 = vmatpush.msrb.mxu1 %v965_v27  ;;  %v1288_v17 = vpop.f32.mrf.mxu0 }
 0x170   :  { %1661 = vmatpush.msrb.mxu2 %v827_v29  ;;  %1681 = vmatpush.msrb.mxu3 %v875_v30  ;;  %v1209_v29 = vadd.f32 %v1208_v10, %v1189_v21  ;;  %v1766_v10 = vld [vmem:[%s4326_s5 + $0x100] sm:$0xff] }
 0x171   :  { %1700 = vmatpush.msrb.mxu0 %v926_v31  ;;  %1724 = vmatpush.msrb.mxu1 %v962_v32  ;;  %v1738_v31 = vld [vmem:[%s4326_s5 + $0x20] sm:$0xff] }
 0x172   :  { %1662 = vmatpush.msrb.mxu2 %v824_v35  ;;  %1682 = vmatpush.msrb.mxu3 %v872_v36  ;;  %v1229_v35 = vadd.f32 %v1228_v11, %v1209_v29 }
 0x173   :  { %1701 = vmatpush.msrb.mxu0 %v923_v38  ;;  %1725 = vmatpush.msrb.mxu1 %v959_v39  ;;  %v1756_v38 = vld [vmem:[%s4326_s5 + $0xb0] sm:$0xff] }
 0x174   :  { %1663 = vmatpush.msrb.mxu2 %v821_v41  ;;  %1683 = vmatpush.msrb.mxu3 %v869_v4  ;;  %v1308_v26 = vpop.f32.mrf.mxu1  ;;  %v1328_v27 = vpop.f32.mrf.mxu2  ;;  %v1736_v41 = vld [vmem:[%s4326_s5 + $0x10] sm:$0xff]  ;;  %v1755_v4 = vld [vmem:[%s4326_s5 + $0xa8] sm:$0xff] }
 0x175   :  { %1702 = vmatpush.msrb.mxu0 %v920_v5  ;;  %1726 = vmatpush.msrb.mxu1 %v956_v42  ;;  %v1249_v5 = vadd.f32 %v4104_v53, %v1229_v35  ;;  %v1735_v42 = vld [vmem:[%s4326_s5 + $0x8] sm:$0xff]  ;;  %v1855_v35 = vld [vmem:[%s4328_s7 + $0x58] sm:$0xff] }
 0x176   :  { %2016 = vmatmul.msk.f32.vlgmr.msrb.gmra.mxu1 %vm998_vm2, %v2977_v61  ;;  %1664 = vmatpush.msrb.mxu2 %v818_v43  ;;  %v812_v61 = vld [vmem:[%s4323_s3 + $0xc10] sm:$0xff] }
 0x177   :  { %1783 = vmatpush.msra.mxu1 %v1749_v19  ;;  %1684 = vmatpush.msrb.mxu3 %v866_v44  ;;  %v1368_v43 = vpop.f32.mrf.mxu0  ;;  %v1734_v44 = vld [vmem:[%s4326_s5] sm:$0xff] }
 0x178   :  { %1703 = vmatpush.msrb.mxu0 %v917_v50  ;;  %1665 = vmatpush.msrb.mxu2 %v815_v57  ;;  %v1731_v50 = vmax.f32 %v1249_v5, 0.0  ;;  %v1848_v5 = vld [vmem:[%s4328_s7 + $0x20] sm:$0xff] }
 0x179   :  { %1784 = vmatpush.msra.mxu1 %v1748_v46  ;;  %1685 = vmatpush.msrb.mxu3 %v863_v47  ;;  %v1752_v47 = vld [vmem:[%s4326_s5 + $0x90] sm:$0xff] }
 0x17a   :  { %1704 = vmatpush.msrb.mxu0 %v914_v56  ;;  %1666 = vmatpush.msrb.mxu2 %v812_v61  ;;  %v1751_v56 = vld [vmem:[%s4326_s5 + $0x88] sm:$0xff] }
 0x17b   :  { %1785 = vmatpush.msra.mxu1 %v1747_v49  ;;  %1686 = vmatpush.msrb.mxu3 %v860_v51  ;;  %v1750_v49 = vld [vmem:[%s4326_s5 + $0x80] sm:$0xff] }
 0x17c   :  { %1705 = vmatpush.msrb.mxu0 %v911_v59  ;;  %1667 = vmatmul.f32.vlgmr.msrb.gmra.mxu2 %v2923_v34  ;;  %v1268_v34 = vpop.f32.mrf.mxu3  ;;  %v1388_v57 = vpop.f32.mrf.mxu1 }
 0x17d   :  { %1687 = vmatmul.f32.vlgmr.msrb.gmra.mxu3 %v2935_v40  ;;  %1786 = vmatpush.msra.mxu1 %v1746_v60  ;;  %v1763_v40 = vld [vmem:[%s4326_s5 + $0xe8] sm:$0xff]  ;;  %v1269_v13 = vadd.f32 %v1268_v34, %v993_v6  ;;  %v1770_v6 = vld [vmem:[%s4326_s5 + $0x120] sm:$0xff] }
 0x17e   :  { %1706 = vmatpush.msrb.mxu0 %v908_v62  ;;  %1803 = vmatpush.msra.mxu2 %v1765_v63 }
 0x17f   :  { %1707 = vmatmul.f32.vlgmr.msrb.gmra.mxu0 %v2966_v55  ;;  %1787 = vmatpush.msra.mxu1 %v1745_v1  ;;  %v1742_v55 = vld [vmem:[%s4326_s5 + $0x40] sm:$0xff]  ;;  %v1289_v22 = vadd.f32 %v1288_v17, %v1269_v13  ;;  %v1771_v1 = vld [vmem:[%s4326_s5 + $0x128] sm:$0xf] }
 0x180   :  { %1804 = vmatpush.msra.mxu2 %v1764_v3  ;;  %2017 = vmatpush.msk.msra.mxu3 %vm137_vm0, %v1771_v1 }
 0x181   :  { %1788 = vmatpush.msra.mxu1 %v1744_v7  ;;  %v1309_v30 = vadd.f32 %v1308_v26, %v1289_v22  ;;  %v1408_v46 = vpop.f32.mrf.mxu2  ;;  %v1769_v7 = vld [vmem:[%s4326_s5 + $0x118] sm:$0xff] }
 0x182   :  { %1805 = vmatpush.msra.mxu2 %v1763_v40  ;;  %1834 = vmatpush.msra.mxu3 %v1770_v6  ;;  %v1768_v40 = vld [vmem:[%s4326_s5 + $0x110] sm:$0xff] }
 0x183   :  { %1789 = vmatpush.msra.mxu1 %v1743_v9  ;;  %v1329_v36 = vadd.f32 %v1328_v27, %v1309_v30 }
 0x184   :  { %1806 = vmatpush.msra.mxu2 %v1762_v12  ;;  %v1348_v32 = vpop.f32.mrf.mxu3  ;;  %1835 = vmatpush.msra.mxu3 %v1769_v7 }
 0x185   :  { %1790 = vmatpush.msra.mxu1 %v1742_v55  ;;  %v1349_v39 = vadd.f32 %v1348_v32, %v1329_v36  ;;  %v1854_v36 = vld [vmem:[%s4328_s7 + $0x50] sm:$0xff] }
 0x186   :  { %1807 = vmatpush.msra.mxu2 %v1761_v14  ;;  %1836 = vmatpush.msra.mxu3 %v1768_v40  ;;  %v2029_v40 = vld [vmem:[%s4333_s12] ss:$0 sm:$0xff] }
 0x187   :  { %1791 = vmatpush.msra.mxu1 %v1741_v16  ;;  %v1369_v19 = vadd.f32 %v1368_v43, %v1349_v39  ;;  %v1851_v39 = vld [vmem:[%s4328_s7 + $0x38] sm:$0xff]  ;;  %v1846_v43 = vld [vmem:[%s4328_s7 + $0x10] sm:$0xff] }
 0x188   :  { %1808 = vmatpush.msra.mxu2 %v1760_v20  ;;  %1837 = vmatpush.msra.mxu3 %v1767_v8 }
 0x189   :  { %1792 = vmatpush.msra.mxu1 %v1740_v23  ;;  %v1389_v53 = vadd.f32 %v1388_v57, %v1369_v19  ;;  %v1844_v19 = vld [vmem:[%s4328_s7] sm:$0xff]  ;;  %v1892_v57 = vld [vmem:[%s4330_s9 + $0x18] sm:$0xff] }
 0x18a   :  { %1809 = vmatpush.msra.mxu2 %v1759_v24  ;;  %1838 = vmatpush.msra.mxu3 %v1766_v10 }
 0x18b   :  { %1793 = vmatpush.msra.mxu1 %v1739_v25  ;;  %v1409_v61 = vadd.f32 %v1408_v46, %v1389_v53  ;;  %v2026_v46 = vld [vmem:[%s4327_s6] ss:$0 sm:$0xff] }
 0x18c   :  { %1810 = vmatpush.msra.mxu2 %v1758_v28 }
 0x18d   :  { %1794 = vmatpush.msra.mxu1 %v1738_v31 }
 0x18e   :  { %1811 = vmatpush.msra.mxu2 %v1757_v33  ;;  %v1856_v33 = vld [vmem:[%s4328_s7 + $0x60] sm:$0xf] }
 0x18f   :  { %1795 = vmatpush.msra.mxu1 %v1737_v37  ;;  %2019 = vmatpush.msk.msra.mxu0 %vm137_vm0, %v1856_v33  ;;  %v1853_v37 = vld [vmem:[%s4328_s7 + $0x48] sm:$0xff] }
 0x190   :  { %1812 = vmatpush.msra.mxu2 %v1756_v38  ;;  %v1852_v38 = vld [vmem:[%s4328_s7 + $0x40] sm:$0xff] }
 0x191   :  { %1796 = vmatpush.msra.mxu1 %v1736_v41  ;;  %1872 = vmatpush.msra.mxu0 %v1855_v35  ;;  %v1850_v41 = vld [vmem:[%s4328_s7 + $0x30] sm:$0xff] }
 0x192   :  { %1813 = vmatpush.msra.mxu2 %v1755_v4  ;;  %v1849_v4 = vld [vmem:[%s4328_s7 + $0x28] sm:$0xff] }
 0x193   :  { %1797 = vmatpush.msra.mxu1 %v1735_v42  ;;  %1873 = vmatpush.msra.mxu0 %v1854_v36  ;;  %v1847_v42 = vld [vmem:[%s4328_s7 + $0x18] sm:$0xff] }
 0x194   :  { %1814 = vmatpush.msra.mxu2 %v1754_v18  ;;  %v1845_v18 = vld [vmem:[%s4328_s7 + $0x8] sm:$0xff] }
 0x195   :  { %1798 = vmatpush.msra.mxu1 %v1734_v44  ;;  %1874 = vmatpush.msra.mxu0 %v1853_v37  ;;  %v1895_v44 = vld [vmem:[%s4330_s9 + $0x30] sm:$0x3] }
 0x196   :  { %1799 = vmatmul.f32.vlgmr.msra.gmra.mxu1 %v1731_v50  ;;  %1815 = vmatpush.msra.mxu2 %v1753_v45  ;;  %v1448_v54 = vpop.f32.mrf.mxu0  ;;  %v1468_v59 = vpop.f32.mrf.mxu1  ;;  %v1894_v45 = vld [vmem:[%s4330_s9 + $0x28] sm:$0xff]  ;;  %v1893_v50 = vld [vmem:[%s4330_s9 + $0x20] sm:$0xff] }
 0x197   :  { %1875 = vmatpush.msra.mxu0 %v1852_v38  ;;  %2021 = vmatpush.msk.msrb.mxu3 %vm1904_vm4, %v1895_v44 }
 0x198   :  { %1816 = vmatpush.msra.mxu2 %v1752_v47 }
 0x199   :  { %v1428_v48 = vpop.f32.mrf.mxu3  ;;  %v1488_v62 = vpop.f32.mrf.mxu2  ;;  %1876 = vmatpush.msra.mxu0 %v1851_v39  ;;  %1918 = vmatpush.msrb.mxu3 %v1894_v45 }
 0x19a   :  { %v1429_v51 = vadd.f32 %v1428_v48, %v1409_v61  ;;  %1817 = vmatpush.msra.mxu2 %v1751_v56 }
 0x19b   :  { %1877 = vmatpush.msra.mxu0 %v1850_v41  ;;  %1919 = vmatpush.msrb.mxu3 %v1893_v50 }
 0x19c   :  { %v1449_v58 = vadd.f32 %v1448_v54, %v1429_v51  ;;  %1818 = vmatpush.msra.mxu2 %v1750_v49  ;;  %v1891_v54 = vld [vmem:[%s4330_s9 + $0x10] sm:$0xff] }
 0x19d   :  { %1878 = vmatpush.msra.mxu0 %v1849_v4  ;;  %1920 = vmatpush.msrb.mxu3 %v1892_v57 }
 0x19e   :  { %v1469_v60 = vadd.f32 %v1468_v59, %v1449_v58  ;;  %v1890_v58 = vld [vmem:[%s4330_s9 + $0x8] sm:$0xff]  ;;  %v1889_v59 = vld [vmem:[%s4330_s9] sm:$0xff] }
 0x19f   :  { %1879 = vmatpush.msra.mxu0 %v1848_v5  ;;  %1921 = vmatpush.msrb.mxu3 %v1891_v54 }
 0x1a0   :  { %v1489_v63 = vadd.f32 %v1488_v62, %v1469_v60  ;;  %v1930_v60 = vld [vmem:[%s4332_s11 + $0x8] sm:$0x3]  ;;  %v2027_v62 = vld [vmem:[%s4329_s8] ss:$0 sm:$0xff] }
 0x1a1   :  { %1880 = vmatpush.msra.mxu0 %v1847_v42  ;;  %1922 = vmatpush.msrb.mxu3 %v1890_v58 }
 0x1a2   :  { %v1732_v0 = vmax.f32 %v1489_v63, 0.0 }
 0x1a3   :  { %1881 = vmatpush.msra.mxu0 %v1846_v43  ;;  %1923 = vmatpush.msrb.mxu3 %v1889_v59 }
 0x1a4   :  { %1819 = vmatmul.f32.vlgmr.msra.gmra.mxu2 %v1732_v0 }
 0x1a5   :  { %1882 = vmatpush.msra.mxu0 %v1845_v18 }
 0x1a7   :  { %1883 = vmatpush.msra.mxu0 %v1844_v19 }
 0x1b8   :  { %v1548_v11 = vpop.f32.mrf.mxu0  ;;  %v1568_v13 = vpop.f32.mrf.mxu1 }
 0x1bb   :  { %v1508_v3 = vpop.f32.mrf.mxu2  ;;  %v1528_v52 = vpop.f32.mrf.mxu3 }
 0x1bc   :  { %v1509_v34 = vadd.f32 %v1508_v3, %v994_v2  ;;  %v1929_v2 = vld [vmem:[%s4332_s11] sm:$0xff] }
 0x1bd   :  { %v2028_v3 = vld [vmem:[%s4331_s10] ss:$0 sm:$0xff] }
 0x1be   :  { %v1529_v9 = vadd.f32 %v1528_v52, %v1509_v34 }
 0x1c0   :  { %v1549_v12 = vadd.f32 %v1548_v11, %v1529_v9 }
 0x1c2   :  { %v1569_v14 = vadd.f32 %v1568_v13, %v1549_v12 }
 0x1da   :  { %v1628_v20 = vpop.f32.mrf.mxu0  ;;  %v1648_v22 = vpop.f32.mrf.mxu1 }
 0x1dd   :  { %v1588_v55 = vpop.f32.mrf.mxu2  ;;  %v1608_v16 = vpop.f32.mrf.mxu3 }
 0x1de   :  { %v1589_v15 = vadd.f32 %v1588_v55, %v1569_v14 }
 0x1e0   :  { %v1609_v17 = vadd.f32 %v1608_v16, %v1589_v15 }
 0x1e2   :  { %v1629_v21 = vadd.f32 %v1628_v20, %v1609_v17 }
 0x1e4   :  { %v1649_v23 = vadd.f32 %v1648_v22, %v1629_v21 }
 0x1f3   :  { %v1728_v30 = vpop.f32.mrf.mxu1 }
 0x1fc   :  { %v1708_v28 = vpop.f32.mrf.mxu0 }
 0x1ff   :  { %v1668_v24 = vpop.f32.mrf.mxu2 }
 0x200   :  { %v1669_v25 = vadd.f32 %v1668_v24, %v1649_v23  ;;  %v1688_v26 = vpop.f32.mrf.mxu3 }
 0x202   :  { %v1689_v27 = vadd.f32 %v1688_v26, %v1669_v25 }
 0x204   :  { %v1709_v29 = vadd.f32 %v1708_v28, %v1689_v27 }
 0x206   :  { %v1729_v31 = vadd.f32 %v1728_v30, %v1709_v29 }
 0x208   :  { %v1733_v32 = vmax.f32 %v1729_v31, 0.0 }
 0x20a   :  { %2018 = vmatmul.msk.f32.vlgmr.msra.gmra.mxu3 %vm1776_vm3, %v1733_v32 }
 0x20b   :  { %2023 = vmatpush.msk.msra.mxu3 %vm1904_vm4, %v1930_v60 }
 0x20d   :  { %1957 = vmatpush.msra.mxu3 %v1929_v2 }
 0x213   :  { %v1800_v47 = vpop.f32.mrf.mxu1 }
 0x214   :  { %v1801_v56 = vadd.f32 %v2026_v46, %v1800_v47 }
 0x227   :  { %v1820_v53 = vpop.f32.mrf.mxu2 }
 0x228   :  { %v1821_v61 = vadd.f32 %v1820_v53, %v1801_v56 }
 0x28d   :  { %v1840_v48 = vpop.f32.mrf.mxu3 }
 0x28e   :  { %v1841_v49 = vadd.f32 %v1840_v48, %v1821_v61 }
 0x290   :  { %v1843_v51 = vmax.f32 %v1841_v49, 0.0 }
 0x292   :  { %2020 = vmatmul.msk.f32.vlgmr.msra.gmra.mxu0 %vm1861_vm5, %v1843_v51 }
 0x30f   :  { %v1885_v63 = vpop.f32.mrf.mxu0 }
 0x310   :  { %v1886_v0 = vadd.f32 %v2027_v62, %v1885_v63 }
 0x312   :  { %v1888_v1 = vmax.f32 %v1886_v0, 0.0 }
 0x314   :  { %2022 = vmatmul.msk.f32.vlgmr.msrb.gmra.mxu3 %vm1900_vm6, %v1888_v1 }
 0x397   :  { %v1925_v6 = vpop.f32.mrf.mxu3 }
 0x398   :  { %v1926_v7 = vadd.f32 %v2028_v3, %v1925_v6 }
 0x39a   :  { %v1928_v34 = vmax.f32 %v1926_v7, 0.0 }
 0x39c   :  { %2024 = vmatmul.msk.f32.vlgmr.msra.gmra.mxu3 %vm1935_vm7, %v1928_v34 }
 0x41f   :  { %v1959_v52 = vpop.f32.mrf.mxu3 }
 0x420   :  { %v1960_v8 = vadd.f32 %v2029_v40, %v1959_v52 }
 0x422   :  { %v2025_v9 = vmul.f32 -1.442695, %v1960_v8 }
 0x424   :  { %2030 = vpow2.f32 %v2025_v9 }
 0x42a   :  { %v2031_v10 = vpop.eup %2030 }
 0x42b   :  { %v1965_v11 = vadd.f32 1.0, %v2031_v10 }
 0x42d   :  { %2032 = vrcp.f32 %v1965_v11  ;;  %v1977_v14 = vand.u32 2147483648, %v1965_v11  ;;  %v1975_v16 = vand.u32 2147483647, %v1965_v11  ;;  %vm1971_vm9 = vweird.f32 %v1965_v11 }
 0x42f   :  { %v1978_v20 = vor.u32 1.1754944e-38, %v1977_v14  ;;  %vm1976_vm12 = vcmp.eq.f32.partialorder %v1975_v16, 8.507059e+37 }
 0x433   :  { %v2033_v12 = vpop.eup %2032 }
 0x434   :  { %v1967_v13 = vmul.f32 %v2033_v12, %v1965_v11  ;;  %vm1972_vm8 = vweird.f32 %v2033_v12 }
 0x435   :  { %vm1973_vm10 = vmor %vm1971_vm9, %vm1972_vm8 }
 0x436   :  { %v1968_v55 = vsub.f32 1.0, %v1967_v13 }
 0x438   :  { %v1969_v15 = vmul.f32 %v2033_v12, %v1968_v55 }
 0x43a   :  { %v1970_v17 = vadd.f32 %v2033_v12, %v1969_v15 }
 0x43c   :  { %v1974_v21 = vsel %vm1973_vm10, %v2033_v12, %v1970_v17 }
 0x43d   :  { %v1979_v22 = vsel %vm1976_vm12, %v1978_v20, %v1974_v21 }
 0x43e   :  { %1982 = vst.msk [vmem:[%s4334_s13] sm:$0xf] %vm1981_vm11, %v1979_v22 }

</bundles_post_ra>
